<compile_context>
chip_gen: v5e
topology: v5e:2x2
jax: 0.10.0
libtpu: 0.0.40
codegen_flags: <defaults>
</compile_context>

<pallas_src>
import functools

import jax
import jax.numpy as jnp
import numpy as np
from jax.experimental import pallas as pl
from jax.experimental.pallas import tpu as pltpu

EPS = 1e-5      # PyTorch BatchNorm1d default eps
CP = 128        # every channel axis is zero-padded to one full 128-lane row


# ------------------------------ fused kernel --------------------------------

def _encoder_kernel(x_ref, w1_ref, b1_ref, sel_ref, wa_ref, ba_ref, wb_ref, bb_ref,
                    mask_ref, sumsel_ref, s2_ref, b2_ref, fcw_ref, fcb_ref,
                    o_ref, pad_ref, *, k1, r, ni, nblocks):
    """Whole encoder for BB flattened batch elements; activations stay on-chip."""
    # ---- conv1 (k=7, pad=3; stride-2 deferred to the pool) + folded BN1 + ReLU
    # Computed at stride 1 as k1 contiguous-tap MXU matmuls over the flat
    # (BB*xstride, CP) input; rows that straddle two batch segments are garbage
    # but are never selected by the pool matrices below.
    acc = jnp.dot(x_ref[0:r, :], w1_ref[0], preferred_element_type=jnp.float32)
    for k in range(1, k1):
        acc += jnp.dot(x_ref[k:k + r, :], w1_ref[k],
                       preferred_element_type=jnp.float32)
    h1 = jnp.maximum(acc + b1_ref[...], 0.0)                  # (r, CP), >= 0

    # ---- stride-2 subsample + MaxPool1d(3,2,1), fused as 0/1 selection matmuls.
    # Also scatters each batch segment into the zero-bordered dense-block layout
    # (row b*lps is a zero border, rows +1..+lp hold the activation, row +lp+1 is
    # a zero border).  Zero rows act as -inf pool padding because h1 >= 0.
    m0 = jnp.dot(sel_ref[0], h1, preferred_element_type=jnp.float32)
    m1 = jnp.dot(sel_ref[1], h1, preferred_element_type=jnp.float32)
    m2 = jnp.dot(sel_ref[2], h1, preferred_element_type=jnp.float32)
    pad_ref[...] = jnp.maximum(jnp.maximum(m0, m1), m2)       # (np_rows, CP)

    # ---- dense blocks: (conv k=3 pad=1 + folded BN + ReLU) x 2, Dropout = id ----
    def conv3(w3_ref, b3_ref, blk):
        a = jnp.dot(pad_ref[0:ni, :], w3_ref[blk, 0],
                    preferred_element_type=jnp.float32)
        for k in range(1, 3):
            a += jnp.dot(pad_ref[k:k + ni, :], w3_ref[blk, k],
                         preferred_element_type=jnp.float32)
        # Shifted store realigns conv output with the padded layout; the border
        # mask re-zeroes the rows between batch segments (rows 0 and np_rows-1
        # are never written and keep their zeros from the pool store above).
        pad_ref[1:ni + 1, :] = jnp.maximum(a + b3_ref[blk], 0.0) * mask_ref[...]

    for blk in range(nblocks):
        conv3(wa_ref, ba_ref, blk)
        conv3(wb_ref, bb_ref, blk)

    # ---- head: bn2 -> adaptive_avg_pool1d(1) -> fc -----------------------------
    # mean_L(scale*h + bias) == (scale/L) * sum_L(h) + bias; scale/L folded at prep.
    pooled = jnp.dot(sumsel_ref[...], pad_ref[...],
                     preferred_element_type=jnp.float32)      # (BB, CP) per-batch sums
    pooled = pooled * s2_ref[...] + b2_ref[...]
    o_ref[...] = (jnp.dot(pooled, fcw_ref[...],
                          preferred_element_type=jnp.float32) + fcb_ref[...])


# --------------------------- parameter packing ------------------------------

def _bn_fold(w_pt, bn):
    """Conv1d weight (Cout, Cin, K) + BatchNorm1d(eval) -> (K, CP, CP) folded weight
    and (1, CP) bias, both zero-padded to CP channels."""
    scale = bn["gamma"] / jnp.sqrt(bn["var"] + EPS)
    bias = bn["beta"] - bn["mean"] * scale
    cout, cin, _ = w_pt.shape
    assert cout <= CP and cin <= CP, "channel dims must fit one 128-lane row"
    w = jnp.transpose(w_pt, (2, 1, 0)) * scale[None, None, :]     # (K, Cin, Cout)
    w = jnp.pad(w, ((0, 0), (0, CP - cin), (0, CP - cout)))
    b = jnp.pad(bias, (0, CP - cout)).reshape(1, CP)
    return w.astype(jnp.float32), b.astype(jnp.float32)


def _pool_scatter_selectors(bb, xstride, l1, lp, lps, r):
    """0/1 matrices: stride-2 pick of the stride-1 conv1 output, the three
    MaxPool1d(3,2,1) taps, and the scatter into the zero-bordered layout."""
    sel = np.zeros((3, bb * lps, r), np.float32)
    for b in range(bb):
        for i in range(lp):
            tgt = b * lps + 1 + i
            for t in range(3):
                j = 2 * i + t - 1             # index into the stride-2 conv1 output
                if 0 <= j < l1:
                    sel[t, tgt, b * xstride + 2 * j] = 1.0
    return jnp.asarray(sel)


def _border_mask(bb, lp, lps):
    """Mask over conv3 output rows that zeroes rows landing on segment borders."""
    ni = bb * lps - 2
    m = np.ones((ni, CP), np.float32)
    for b in range(1, bb):
        m[b * lps - 1, :] = 0.0
    for b in range(bb - 1):
        m[b * lps + lp, :] = 0.0
    return jnp.asarray(m)


def _segment_sum_selector(bb, lp, lps):
    s = np.zeros((bb, bb * lps), np.float32)
    for b in range(bb):
        s[b, b * lps + 1: b * lps + 1 + lp] = 1.0
    return jnp.asarray(s)


def pack_params(params, l_in, bb):
    """Fold BN into conv weights, pad channels to CP lanes, build pool/sum
    selectors and border mask for a batch block of `bb`.  Done ONCE."""
    k1, s1, p1 = 7, 2, 3
    xstride = l_in + 2 * p1                          # padded per-batch input rows
    r = bb * xstride - (k1 - 1)                      # stride-1 conv1 rows (flat)
    l1 = (l_in + 2 * p1 - k1) // s1 + 1              # true conv1 (stride-2) length
    lp = (l1 + 2 * 1 - 3) // 2 + 1                   # MaxPool1d(3,2,1) output length
    lps = lp + 2                                     # + two zero border rows
    np_rows = bb * lps
    ni = np_rows - 2                                 # conv3 interior output rows

    w1, b1 = _bn_fold(params["conv1_w"], params["bn1"])
    sel = _pool_scatter_selectors(bb, xstride, l1, lp, lps, r)
    mask = _border_mask(bb, lp, lps)
    sumsel = _segment_sum_selector(bb, lp, lps)

    wa_l, ba_l, wb_l, bb_l = [], [], [], []
    for blk in params["blocks"]:
        w, b = _bn_fold(blk["conv_a_w"], blk["bn_a"]); wa_l.append(w); ba_l.append(b)
        w, b = _bn_fold(blk["conv_b_w"], blk["bn_b"]); wb_l.append(w); bb_l.append(b)
    nblocks = len(params["blocks"])
    if nblocks == 0:                                  # keep array shapes valid
        wa_l = wb_l = [jnp.zeros((3, CP, CP), jnp.float32)]
        ba_l = bb_l = [jnp.zeros((1, CP), jnp.float32)]
    wa, ba = jnp.stack(wa_l), jnp.stack(ba_l)
    wb, bbias = jnp.stack(wb_l), jnp.stack(bb_l)

    bn2 = params["bn2"]
    scale2 = bn2["gamma"] / jnp.sqrt(bn2["var"] + EPS)
    bias2 = bn2["beta"] - bn2["mean"] * scale2
    c_last = int(scale2.shape[0])
    assert c_last <= CP
    s2 = jnp.pad(scale2 / lp, (0, CP - c_last)).reshape(1, CP)   # 1/L folded in
    b2 = jnp.pad(bias2, (0, CP - c_last)).reshape(1, CP)

    c_out = int(params["fc_w"].shape[0])
    assert c_out <= CP
    fcw = jnp.pad(params["fc_w"].T, ((0, CP - c_last), (0, CP - c_out)))
    fcb = jnp.pad(params["fc_b"], (0, CP - c_out)).reshape(1, CP)

    tensors = (w1, b1, sel, wa, ba, wb, bbias, mask, sumsel, s2, b2,
               fcw.astype(jnp.float32), fcb.astype(jnp.float32))
    static = dict(k1=k1, p1=p1, bb=bb, xstride=xstride, r=r, lp=lp, lps=lps,
                  np_rows=np_rows, ni=ni, nblocks=nblocks, c_out=c_out)
    return tensors, static


# -------------------------------- forward -----------------------------------

def _const_spec(shape):
    n = len(shape)
    return pl.BlockSpec(shape, lambda i, _n=n: (0,) * _n)


def densenet_encoder_forward(packed, static, x):
    # x: (B, L, num_input_features); the module's permute(0,2,1) is absorbed by
    # the channels-last layout.
    b, l_in, cin = x.shape
    bb, p1, xstride = static["bb"], static["p1"], static["xstride"]
    assert xstride == l_in + 2 * p1, "pack_params was built for a different length"
    k1, r, ni = static["k1"], static["r"], static["ni"]
    np_rows, nblocks, c_out = static["np_rows"], static["nblocks"], static["c_out"]

    b_pad = ((b + bb - 1) // bb) * bb
    nsteps = b_pad // bb

    # Tiny XLA-side plumbing on the raw input only (per-batch conv1 L-padding +
    # lane padding + flattening BB batch elements per grid step); every
    # intermediate activation stays on-chip inside the single kernel.
    xp = jnp.pad(x.astype(jnp.float32),
                 ((0, b_pad - b), (p1, p1), (0, CP - cin)))
    xp = xp.reshape(nsteps, bb * xstride, CP)

    kern = functools.partial(_encoder_kernel, k1=k1, r=r, ni=ni, nblocks=nblocks)

    flops = 2 * nsteps * CP * (k1 * r * CP                    # conv1 taps
                               + 3 * np_rows * r              # pool selection
                               + nblocks * 2 * 3 * ni * CP    # dense-block convs
                               + bb * np_rows + bb * CP)      # head
    bytes_accessed = int(xp.size * 4 + b_pad * CP * 4
                         + sum(int(t.size) * t.dtype.itemsize for t in packed))

    out = pl.pallas_call(
        kern,
        out_shape=jax.ShapeDtypeStruct((nsteps, bb, CP), jnp.float32),
        grid=(nsteps,),
        in_specs=[pl.BlockSpec((None, bb * xstride, CP), lambda i: (i, 0, 0))]
                 + [_const_spec(t.shape) for t in packed],
        out_specs=pl.BlockSpec((None, bb, CP), lambda i: (i, 0, 0)),
        scratch_shapes=[pltpu.VMEM((np_rows, CP), jnp.float32)],
        compiler_params=pltpu.CompilerParams(dimension_semantics=("parallel",)),
        cost_estimate=pl.CostEstimate(flops=flops, transcendentals=0,
                                      bytes_accessed=bytes_accessed),
    )(xp, *packed)
    return out.reshape(b_pad, CP)[:b, :c_out]


# --------------------------- pure-JAX reference ------------------------------

def reference_forward(params, x):
    """Straightforward channels-last eval-mode forward for correctness checks."""
    def conv1d(h, w, stride, pad):                    # h: (B,L,Cin), w: (Cout,Cin,K)
        _, ln, _ = h.shape
        cout, _, kk = w.shape
        hp = jnp.pad(h, ((0, 0), (pad, pad), (0, 0)))
        lout = (ln + 2 * pad - kk) // stride + 1
        out = jnp.zeros(h.shape[:1] + (lout, cout), jnp.float32)
        for k in range(kk):
            taps = hp[:, k::stride, :][:, :lout, :]
            out = out + jnp.einsum('blc,oc->blo', taps, w[:, :, k])
        return out

    def bn(h, p):
        scale = p["gamma"] / jnp.sqrt(p["var"] + EPS)
        return h * scale + (p["beta"] - p["mean"] * scale)

    def maxpool3s2p1(h):
        _, ln, _ = h.shape
        hp = jnp.pad(h, ((0, 0), (1, 1), (0, 0)), constant_values=-jnp.inf)
        lout = (ln + 2 - 3) // 2 + 1
        taps = [hp[:, t::2, :][:, :lout, :] for t in range(3)]
        return jnp.maximum(jnp.maximum(taps[0], taps[1]), taps[2])

    h = jax.nn.relu(bn(conv1d(x, params["conv1_w"], 2, 3), params["bn1"]))
    h = maxpool3s2p1(h)
    for blk in params["blocks"]:
        h = jax.nn.relu(bn(conv1d(h, blk["conv_a_w"], 1, 1), blk["bn_a"]))
        h = jax.nn.relu(bn(conv1d(h, blk["conv_b_w"], 1, 1), blk["bn_b"]))
    h = bn(h, params["bn2"])
    pooled = h.mean(axis=1)
    return pooled @ params["fc_w"].T + params["fc_b"]


# --------------------------- synthetic parameters ---------------------------

def init_params(key, num_input_features, hidden_layers, growth_rate):
    """Deterministic synthetic parameters matching the nn.Module's shapes."""
    keys = iter(jax.random.split(key, 64))

    def nrm(k, shape, s=0.1):
        return jax.random.normal(k, shape, jnp.float32) * s

    def bn_params(k, c):
        k1, k2, k3, k4 = jax.random.split(k, 4)
        return dict(
            gamma=jax.random.uniform(k1, (c,), jnp.float32, 0.8, 1.2),
            beta=nrm(k2, (c,)),
            mean=nrm(k3, (c,)),                                       # running_mean
            var=jax.random.uniform(k4, (c,), jnp.float32, 0.5, 1.5),  # running_var
        )

    h0 = hidden_layers[0]
    params = {
        "conv1_w": nrm(next(keys), (h0, num_input_features, 7)),
        "bn1": bn_params(next(keys), h0),
    }
    blocks = []
    in_c = h0
    for out_c in hidden_layers[1:]:
        blocks.append(dict(
            conv_a_w=nrm(next(keys), (growth_rate, in_c, 3)),
            bn_a=bn_params(next(keys), growth_rate),
            conv_b_w=nrm(next(keys), (out_c, growth_rate, 3)),
            bn_b=bn_params(next(keys), out_c),
        ))
        in_c = out_c
    params["blocks"] = blocks
    c_last = hidden_layers[-1]
    params["bn2"] = bn_params(next(keys), c_last)
    params["fc_w"] = nrm(next(keys), (c_last, c_last))
    params["fc_b"] = nrm(next(keys), (c_last,))
    return params


if __name__ == "__main__":
    # Small, module-consistent shapes.
    num_input_features = 4
    hidden_layers = [32, 48]
    growth_rate = 16
    # num_blocks / dropout_rate are stored by the module but don't affect eval forward.
    B, L = 2, 16

    key = jax.random.PRNGKey(0)
    k_x, k_p = jax.random.split(key)
    x = jax.random.normal(k_x, (B, L, num_input_features), jnp.float32)
    params = init_params(k_p, num_input_features, hidden_layers, growth_rate)

    # TODO(synk): train-mode BatchNorm (batch statistics) and active Dropout are
    # not implemented; eval-mode semantics (running stats, identity dropout) are.
    bb = min(B, 8)                                   # batch elements per grid step
    packed, static = pack_params(params, L, bb)      # one-time weight prep
    fwd = jax.jit(functools.partial(densenet_encoder_forward, packed, static))
    out = jax.block_until_ready(fwd(x))

    assert out.shape == (B, hidden_layers[-1]), out.shape
    assert bool(jnp.all(jnp.isfinite(out)))

    ref = reference_forward(params, x)
    err = float(jnp.max(jnp.abs(out - ref)))
    tol = 1e-2 * max(1.0, float(jnp.max(jnp.abs(ref))))
    assert err < tol, (err, tol)
    print("KERNEL_OK")
</pallas_src>

<mosaic_0001>
module attributes {stable_mosaic.version = 11 : i64} {
  func.func @_encoder_kernel(%arg0: i32, %arg1: memref<1x44x128xf32, #tpu.memory_space<vmem>>, %arg2: memref<7x128x128xf32, #tpu.memory_space<vmem>>, %arg3: memref<1x128xf32, #tpu.memory_space<vmem>>, %arg4: memref<3x12x38xf32, #tpu.memory_space<vmem>>, %arg5: memref<1x3x128x128xf32, #tpu.memory_space<vmem>>, %arg6: memref<1x1x128xf32, #tpu.memory_space<vmem>>, %arg7: memref<1x3x128x128xf32, #tpu.memory_space<vmem>>, %arg8: memref<1x1x128xf32, #tpu.memory_space<vmem>>, %arg9: memref<10x128xf32, #tpu.memory_space<vmem>>, %arg10: memref<2x12xf32, #tpu.memory_space<vmem>>, %arg11: memref<1x128xf32, #tpu.memory_space<vmem>>, %arg12: memref<1x128xf32, #tpu.memory_space<vmem>>, %arg13: memref<128x128xf32, #tpu.memory_space<vmem>>, %arg14: memref<1x128xf32, #tpu.memory_space<vmem>>, %arg15: memref<1x2x128xf32, #tpu.memory_space<vmem>>, %arg16: memref<12x128xf32, #tpu.memory_space<vmem>>) attributes {dimension_semantics = [#tpu.dimension_semantics<parallel>], iteration_bounds = array<i64: 1>, scalar_prefetch = 0 : i64, scratch_operands = 1 : i64, tpu.core_type = #tpu.core_type<tc>, window_params = [{transform_indices = @transform_0, window_bounds = array<i64: 1, 44, 128>}, {pipeline_mode = #tpu.pipeline_mode<synchronous>, transform_indices = @transform_1, window_bounds = array<i64: 7, 128, 128>}, {pipeline_mode = #tpu.pipeline_mode<synchronous>, transform_indices = @transform_2, window_bounds = array<i64: 1, 128>}, {pipeline_mode = #tpu.pipeline_mode<synchronous>, transform_indices = @transform_3, window_bounds = array<i64: 3, 12, 38>}, {pipeline_mode = #tpu.pipeline_mode<synchronous>, transform_indices = @transform_4, window_bounds = array<i64: 1, 3, 128, 128>}, {pipeline_mode = #tpu.pipeline_mode<synchronous>, transform_indices = @transform_5, window_bounds = array<i64: 1, 1, 128>}, {pipeline_mode = #tpu.pipeline_mode<synchronous>, transform_indices = @transform_6, window_bounds = array<i64: 1, 3, 128, 128>}, {pipeline_mode = #tpu.pipeline_mode<synchronous>, transform_indices = @transform_7, window_bounds = array<i64: 1, 1, 128>}, {pipeline_mode = #tpu.pipeline_mode<synchronous>, transform_indices = @transform_8, window_bounds = array<i64: 10, 128>}, {pipeline_mode = #tpu.pipeline_mode<synchronous>, transform_indices = @transform_9, window_bounds = array<i64: 2, 12>}, {pipeline_mode = #tpu.pipeline_mode<synchronous>, transform_indices = @transform_10, window_bounds = array<i64: 1, 128>}, {pipeline_mode = #tpu.pipeline_mode<synchronous>, transform_indices = @transform_11, window_bounds = array<i64: 1, 128>}, {pipeline_mode = #tpu.pipeline_mode<synchronous>, transform_indices = @transform_12, window_bounds = array<i64: 128, 128>}, {pipeline_mode = #tpu.pipeline_mode<synchronous>, transform_indices = @transform_13, window_bounds = array<i64: 1, 128>}, {transform_indices = @transform_14, window_bounds = array<i64: 1, 2, 128>}]} {
    %c0 = arith.constant 0 : index
    %c0_0 = arith.constant 0 : index
    %c0_1 = arith.constant 0 : index
    %0 = vector.load %arg1[%c0, %c0_0, %c0_1] : memref<1x44x128xf32, #tpu.memory_space<vmem>>, vector<1x38x128xf32>
    %1 = vector.shape_cast %0 : vector<1x38x128xf32> to vector<38x128xf32>
    %c0_2 = arith.constant 0 : index
    %c0_3 = arith.constant 0 : index
    %c0_4 = arith.constant 0 : index
    %2 = vector.load %arg2[%c0_2, %c0_3, %c0_4] : memref<7x128x128xf32, #tpu.memory_space<vmem>>, vector<1x128x128xf32>
    %3 = vector.shape_cast %2 : vector<1x128x128xf32> to vector<128x128xf32>
    %cst = arith.constant dense<0.000000e+00> : vector<38x128xf32>
    %4 = tpu.matmul %1, %3, %cst {dimension_numbers = #tpu.dot_dimension_numbers<[1], [0], [0], [1], [0, 0, 1, 1], [], []>} : vector<38x128xf32>, vector<128x128xf32>, vector<38x128xf32> -> vector<38x128xf32>
    %c0_5 = arith.constant 0 : index
    %c1 = arith.constant 1 : index
    %c0_6 = arith.constant 0 : index
    %5 = vector.load %arg1[%c0_5, %c1, %c0_6] : memref<1x44x128xf32, #tpu.memory_space<vmem>>, vector<1x38x128xf32>
    %6 = vector.shape_cast %5 : vector<1x38x128xf32> to vector<38x128xf32>
    %c1_7 = arith.constant 1 : index
    %c0_8 = arith.constant 0 : index
    %c0_9 = arith.constant 0 : index
    %7 = vector.load %arg2[%c1_7, %c0_8, %c0_9] : memref<7x128x128xf32, #tpu.memory_space<vmem>>, vector<1x128x128xf32>
    %8 = vector.shape_cast %7 : vector<1x128x128xf32> to vector<128x128xf32>
    %cst_10 = arith.constant dense<0.000000e+00> : vector<38x128xf32>
    %9 = tpu.matmul %6, %8, %cst_10 {dimension_numbers = #tpu.dot_dimension_numbers<[1], [0], [0], [1], [0, 0, 1, 1], [], []>} : vector<38x128xf32>, vector<128x128xf32>, vector<38x128xf32> -> vector<38x128xf32>
    %10 = arith.addf %4, %9 : vector<38x128xf32>
    %c0_11 = arith.constant 0 : index
    %c2 = arith.constant 2 : index
    %c0_12 = arith.constant 0 : index
    %11 = vector.load %arg1[%c0_11, %c2, %c0_12] : memref<1x44x128xf32, #tpu.memory_space<vmem>>, vector<1x38x128xf32>
    %12 = vector.shape_cast %11 : vector<1x38x128xf32> to vector<38x128xf32>
    %c2_13 = arith.constant 2 : index
    %c0_14 = arith.constant 0 : index
    %c0_15 = arith.constant 0 : index
    %13 = vector.load %arg2[%c2_13, %c0_14, %c0_15] : memref<7x128x128xf32, #tpu.memory_space<vmem>>, vector<1x128x128xf32>
    %14 = vector.shape_cast %13 : vector<1x128x128xf32> to vector<128x128xf32>
    %cst_16 = arith.constant dense<0.000000e+00> : vector<38x128xf32>
    %15 = tpu.matmul %12, %14, %cst_16 {dimension_numbers = #tpu.dot_dimension_numbers<[1], [0], [0], [1], [0, 0, 1, 1], [], []>} : vector<38x128xf32>, vector<128x128xf32>, vector<38x128xf32> -> vector<38x128xf32>
    %16 = arith.addf %10, %15 : vector<38x128xf32>
    %c0_17 = arith.constant 0 : index
    %c3 = arith.constant 3 : index
    %c0_18 = arith.constant 0 : index
    %17 = vector.load %arg1[%c0_17, %c3, %c0_18] : memref<1x44x128xf32, #tpu.memory_space<vmem>>, vector<1x38x128xf32>
    %18 = vector.shape_cast %17 : vector<1x38x128xf32> to vector<38x128xf32>
    %c3_19 = arith.constant 3 : index
    %c0_20 = arith.constant 0 : index
    %c0_21 = arith.constant 0 : index
    %19 = vector.load %arg2[%c3_19, %c0_20, %c0_21] : memref<7x128x128xf32, #tpu.memory_space<vmem>>, vector<1x128x128xf32>
    %20 = vector.shape_cast %19 : vector<1x128x128xf32> to vector<128x128xf32>
    %cst_22 = arith.constant dense<0.000000e+00> : vector<38x128xf32>
    %21 = tpu.matmul %18, %20, %cst_22 {dimension_numbers = #tpu.dot_dimension_numbers<[1], [0], [0], [1], [0, 0, 1, 1], [], []>} : vector<38x128xf32>, vector<128x128xf32>, vector<38x128xf32> -> vector<38x128xf32>
    %22 = arith.addf %16, %21 : vector<38x128xf32>
    %c0_23 = arith.constant 0 : index
    %c4 = arith.constant 4 : index
    %c0_24 = arith.constant 0 : index
    %23 = vector.load %arg1[%c0_23, %c4, %c0_24] : memref<1x44x128xf32, #tpu.memory_space<vmem>>, vector<1x38x128xf32>
    %24 = vector.shape_cast %23 : vector<1x38x128xf32> to vector<38x128xf32>
    %c4_25 = arith.constant 4 : index
    %c0_26 = arith.constant 0 : index
    %c0_27 = arith.constant 0 : index
    %25 = vector.load %arg2[%c4_25, %c0_26, %c0_27] : memref<7x128x128xf32, #tpu.memory_space<vmem>>, vector<1x128x128xf32>
    %26 = vector.shape_cast %25 : vector<1x128x128xf32> to vector<128x128xf32>
    %cst_28 = arith.constant dense<0.000000e+00> : vector<38x128xf32>
    %27 = tpu.matmul %24, %26, %cst_28 {dimension_numbers = #tpu.dot_dimension_numbers<[1], [0], [0], [1], [0, 0, 1, 1], [], []>} : vector<38x128xf32>, vector<128x128xf32>, vector<38x128xf32> -> vector<38x128xf32>
    %28 = arith.addf %22, %27 : vector<38x128xf32>
    %c0_29 = arith.constant 0 : index
    %c5 = arith.constant 5 : index
    %c0_30 = arith.constant 0 : index
    %29 = vector.load %arg1[%c0_29, %c5, %c0_30] : memref<1x44x128xf32, #tpu.memory_space<vmem>>, vector<1x38x128xf32>
    %30 = vector.shape_cast %29 : vector<1x38x128xf32> to vector<38x128xf32>
    %c5_31 = arith.constant 5 : index
    %c0_32 = arith.constant 0 : index
    %c0_33 = arith.constant 0 : index
    %31 = vector.load %arg2[%c5_31, %c0_32, %c0_33] : memref<7x128x128xf32, #tpu.memory_space<vmem>>, vector<1x128x128xf32>
    %32 = vector.shape_cast %31 : vector<1x128x128xf32> to vector<128x128xf32>
    %cst_34 = arith.constant dense<0.000000e+00> : vector<38x128xf32>
    %33 = tpu.matmul %30, %32, %cst_34 {dimension_numbers = #tpu.dot_dimension_numbers<[1], [0], [0], [1], [0, 0, 1, 1], [], []>} : vector<38x128xf32>, vector<128x128xf32>, vector<38x128xf32> -> vector<38x128xf32>
    %34 = arith.addf %28, %33 : vector<38x128xf32>
    %c0_35 = arith.constant 0 : index
    %c6 = arith.constant 6 : index
    %c0_36 = arith.constant 0 : index
    %35 = vector.load %arg1[%c0_35, %c6, %c0_36] : memref<1x44x128xf32, #tpu.memory_space<vmem>>, vector<1x38x128xf32>
    %36 = vector.shape_cast %35 : vector<1x38x128xf32> to vector<38x128xf32>
    %c6_37 = arith.constant 6 : index
    %c0_38 = arith.constant 0 : index
    %c0_39 = arith.constant 0 : index
    %37 = vector.load %arg2[%c6_37, %c0_38, %c0_39] : memref<7x128x128xf32, #tpu.memory_space<vmem>>, vector<1x128x128xf32>
    %38 = vector.shape_cast %37 : vector<1x128x128xf32> to vector<128x128xf32>
    %cst_40 = arith.constant dense<0.000000e+00> : vector<38x128xf32>
    %39 = tpu.matmul %36, %38, %cst_40 {dimension_numbers = #tpu.dot_dimension_numbers<[1], [0], [0], [1], [0, 0, 1, 1], [], []>} : vector<38x128xf32>, vector<128x128xf32>, vector<38x128xf32> -> vector<38x128xf32>
    %40 = arith.addf %34, %39 : vector<38x128xf32>
    %c0_41 = arith.constant 0 : index
    %c0_42 = arith.constant 0 : index
    %41 = vector.load %arg3[%c0_41, %c0_42] : memref<1x128xf32, #tpu.memory_space<vmem>>, vector<1x128xf32>
    %42 = vector.broadcast %41 : vector<1x128xf32> to vector<38x128xf32>
    %43 = arith.addf %40, %42 : vector<38x128xf32>
    %cst_43 = arith.constant 0.000000e+00 : f32
    %44 = vector.broadcast %cst_43 : f32 to vector<38x128xf32>
    %45 = arith.maximumf %43, %44 : vector<38x128xf32>
    %c0_44 = arith.constant 0 : index
    %c0_45 = arith.constant 0 : index
    %c0_46 = arith.constant 0 : index
    %46 = vector.load %arg4[%c0_44, %c0_45, %c0_46] : memref<3x12x38xf32, #tpu.memory_space<vmem>>, vector<1x12x38xf32>
    %47 = vector.shape_cast %46 : vector<1x12x38xf32> to vector<12x38xf32>
    %cst_47 = arith.constant dense<0.000000e+00> : vector<12x128xf32>
    %48 = tpu.matmul %47, %45, %cst_47 {dimension_numbers = #tpu.dot_dimension_numbers<[1], [0], [0], [1], [0, 0, 1, 1], [], []>} : vector<12x38xf32>, vector<38x128xf32>, vector<12x128xf32> -> vector<12x128xf32>
    %c1_48 = arith.constant 1 : index
    %c0_49 = arith.constant 0 : index
    %c0_50 = arith.constant 0 : index
    %49 = vector.load %arg4[%c1_48, %c0_49, %c0_50] : memref<3x12x38xf32, #tpu.memory_space<vmem>>, vector<1x12x38xf32>
    %50 = vector.shape_cast %49 : vector<1x12x38xf32> to vector<12x38xf32>
    %cst_51 = arith.constant dense<0.000000e+00> : vector<12x128xf32>
    %51 = tpu.matmul %50, %45, %cst_51 {dimension_numbers = #tpu.dot_dimension_numbers<[1], [0], [0], [1], [0, 0, 1, 1], [], []>} : vector<12x38xf32>, vector<38x128xf32>, vector<12x128xf32> -> vector<12x128xf32>
    %c2_52 = arith.constant 2 : index
    %c0_53 = arith.constant 0 : index
    %c0_54 = arith.constant 0 : index
    %52 = vector.load %arg4[%c2_52, %c0_53, %c0_54] : memref<3x12x38xf32, #tpu.memory_space<vmem>>, vector<1x12x38xf32>
    %53 = vector.shape_cast %52 : vector<1x12x38xf32> to vector<12x38xf32>
    %cst_55 = arith.constant dense<0.000000e+00> : vector<12x128xf32>
    %54 = tpu.matmul %53, %45, %cst_55 {dimension_numbers = #tpu.dot_dimension_numbers<[1], [0], [0], [1], [0, 0, 1, 1], [], []>} : vector<12x38xf32>, vector<38x128xf32>, vector<12x128xf32> -> vector<12x128xf32>
    %55 = arith.maximumf %48, %51 : vector<12x128xf32>
    %56 = arith.maximumf %55, %54 : vector<12x128xf32>
    %c0_56 = arith.constant 0 : index
    %c0_57 = arith.constant 0 : index
    %57 = vector.load %arg16[%c0_56, %c0_57] : memref<12x128xf32, #tpu.memory_space<vmem>>, vector<12x128xf32>
    tpu.vector_store %arg16[%c0_56, %c0_57], %56 {strides = array<i32>} : memref<12x128xf32, #tpu.memory_space<vmem>>, vector<12x128xf32>,
    %c0_58 = arith.constant 0 : index
    %c0_59 = arith.constant 0 : index
    %58 = vector.load %arg16[%c0_58, %c0_59] : memref<12x128xf32, #tpu.memory_space<vmem>>, vector<10x128xf32>
    %c0_60 = arith.constant 0 : index
    %c0_61 = arith.constant 0 : index
    %c0_62 = arith.constant 0 : index
    %c0_63 = arith.constant 0 : index
    %59 = vector.load %arg5[%c0_60, %c0_61, %c0_62, %c0_63] : memref<1x3x128x128xf32, #tpu.memory_space<vmem>>, vector<1x1x128x128xf32>
    %60 = vector.shape_cast %59 : vector<1x1x128x128xf32> to vector<128x128xf32>
    %cst_64 = arith.constant dense<0.000000e+00> : vector<10x128xf32>
    %61 = tpu.matmul %58, %60, %cst_64 {dimension_numbers = #tpu.dot_dimension_numbers<[1], [0], [0], [1], [0, 0, 1, 1], [], []>} : vector<10x128xf32>, vector<128x128xf32>, vector<10x128xf32> -> vector<10x128xf32>
    %c1_65 = arith.constant 1 : index
    %c0_66 = arith.constant 0 : index
    %62 = vector.load %arg16[%c1_65, %c0_66] : memref<12x128xf32, #tpu.memory_space<vmem>>, vector<10x128xf32>
    %c0_67 = arith.constant 0 : index
    %c1_68 = arith.constant 1 : index
    %c0_69 = arith.constant 0 : index
    %c0_70 = arith.constant 0 : index
    %63 = vector.load %arg5[%c0_67, %c1_68, %c0_69, %c0_70] : memref<1x3x128x128xf32, #tpu.memory_space<vmem>>, vector<1x1x128x128xf32>
    %64 = vector.shape_cast %63 : vector<1x1x128x128xf32> to vector<128x128xf32>
    %cst_71 = arith.constant dense<0.000000e+00> : vector<10x128xf32>
    %65 = tpu.matmul %62, %64, %cst_71 {dimension_numbers = #tpu.dot_dimension_numbers<[1], [0], [0], [1], [0, 0, 1, 1], [], []>} : vector<10x128xf32>, vector<128x128xf32>, vector<10x128xf32> -> vector<10x128xf32>
    %66 = arith.addf %61, %65 : vector<10x128xf32>
    %c2_72 = arith.constant 2 : index
    %c0_73 = arith.constant 0 : index
    %67 = vector.load %arg16[%c2_72, %c0_73] : memref<12x128xf32, #tpu.memory_space<vmem>>, vector<10x128xf32>
    %c0_74 = arith.constant 0 : index
    %c2_75 = arith.constant 2 : index
    %c0_76 = arith.constant 0 : index
    %c0_77 = arith.constant 0 : index
    %68 = vector.load %arg5[%c0_74, %c2_75, %c0_76, %c0_77] : memref<1x3x128x128xf32, #tpu.memory_space<vmem>>, vector<1x1x128x128xf32>
    %69 = vector.shape_cast %68 : vector<1x1x128x128xf32> to vector<128x128xf32>
    %cst_78 = arith.constant dense<0.000000e+00> : vector<10x128xf32>
    %70 = tpu.matmul %67, %69, %cst_78 {dimension_numbers = #tpu.dot_dimension_numbers<[1], [0], [0], [1], [0, 0, 1, 1], [], []>} : vector<10x128xf32>, vector<128x128xf32>, vector<10x128xf32> -> vector<10x128xf32>
    %71 = arith.addf %66, %70 : vector<10x128xf32>
    %c0_79 = arith.constant 0 : index
    %c0_80 = arith.constant 0 : index
    %c0_81 = arith.constant 0 : index
    %72 = vector.load %arg6[%c0_79, %c0_80, %c0_81] : memref<1x1x128xf32, #tpu.memory_space<vmem>>, vector<1x1x128xf32>
    %73 = vector.shape_cast %72 : vector<1x1x128xf32> to vector<1x128xf32>
    %74 = vector.broadcast %73 : vector<1x128xf32> to vector<10x128xf32>
    %75 = arith.addf %71, %74 : vector<10x128xf32>
    %cst_82 = arith.constant 0.000000e+00 : f32
    %76 = vector.broadcast %cst_82 : f32 to vector<10x128xf32>
    %77 = arith.maximumf %75, %76 : vector<10x128xf32>
    %c0_83 = arith.constant 0 : index
    %c0_84 = arith.constant 0 : index
    %78 = vector.load %arg9[%c0_83, %c0_84] : memref<10x128xf32, #tpu.memory_space<vmem>>, vector<10x128xf32>
    %79 = arith.mulf %77, %78 : vector<10x128xf32>
    %c1_85 = arith.constant 1 : index
    %c0_86 = arith.constant 0 : index
    %80 = vector.load %arg16[%c1_85, %c0_86] : memref<12x128xf32, #tpu.memory_space<vmem>>, vector<10x128xf32>
    tpu.vector_store %arg16[%c1_85, %c0_86], %79 {strides = array<i32>} : memref<12x128xf32, #tpu.memory_space<vmem>>, vector<10x128xf32>,
    %c0_87 = arith.constant 0 : index
    %c0_88 = arith.constant 0 : index
    %81 = vector.load %arg16[%c0_87, %c0_88] : memref<12x128xf32, #tpu.memory_space<vmem>>, vector<10x128xf32>
    %c0_89 = arith.constant 0 : index
    %c0_90 = arith.constant 0 : index
    %c0_91 = arith.constant 0 : index
    %c0_92 = arith.constant 0 : index
    %82 = vector.load %arg7[%c0_89, %c0_90, %c0_91, %c0_92] : memref<1x3x128x128xf32, #tpu.memory_space<vmem>>, vector<1x1x128x128xf32>
    %83 = vector.shape_cast %82 : vector<1x1x128x128xf32> to vector<128x128xf32>
    %cst_93 = arith.constant dense<0.000000e+00> : vector<10x128xf32>
    %84 = tpu.matmul %81, %83, %cst_93 {dimension_numbers = #tpu.dot_dimension_numbers<[1], [0], [0], [1], [0, 0, 1, 1], [], []>} : vector<10x128xf32>, vector<128x128xf32>, vector<10x128xf32> -> vector<10x128xf32>
    %c1_94 = arith.constant 1 : index
    %c0_95 = arith.constant 0 : index
    %85 = vector.load %arg16[%c1_94, %c0_95] : memref<12x128xf32, #tpu.memory_space<vmem>>, vector<10x128xf32>
    %c0_96 = arith.constant 0 : index
    %c1_97 = arith.constant 1 : index
    %c0_98 = arith.constant 0 : index
    %c0_99 = arith.constant 0 : index
    %86 = vector.load %arg7[%c0_96, %c1_97, %c0_98, %c0_99] : memref<1x3x128x128xf32, #tpu.memory_space<vmem>>, vector<1x1x128x128xf32>
    %87 = vector.shape_cast %86 : vector<1x1x128x128xf32> to vector<128x128xf32>
    %cst_100 = arith.constant dense<0.000000e+00> : vector<10x128xf32>
    %88 = tpu.matmul %85, %87, %cst_100 {dimension_numbers = #tpu.dot_dimension_numbers<[1], [0], [0], [1], [0, 0, 1, 1], [], []>} : vector<10x128xf32>, vector<128x128xf32>, vector<10x128xf32> -> vector<10x128xf32>
    %89 = arith.addf %84, %88 : vector<10x128xf32>
    %c2_101 = arith.constant 2 : index
    %c0_102 = arith.constant 0 : index
    %90 = vector.load %arg16[%c2_101, %c0_102] : memref<12x128xf32, #tpu.memory_space<vmem>>, vector<10x128xf32>
    %c0_103 = arith.constant 0 : index
    %c2_104 = arith.constant 2 : index
    %c0_105 = arith.constant 0 : index
    %c0_106 = arith.constant 0 : index
    %91 = vector.load %arg7[%c0_103, %c2_104, %c0_105, %c0_106] : memref<1x3x128x128xf32, #tpu.memory_space<vmem>>, vector<1x1x128x128xf32>
    %92 = vector.shape_cast %91 : vector<1x1x128x128xf32> to vector<128x128xf32>
    %cst_107 = arith.constant dense<0.000000e+00> : vector<10x128xf32>
    %93 = tpu.matmul %90, %92, %cst_107 {dimension_numbers = #tpu.dot_dimension_numbers<[1], [0], [0], [1], [0, 0, 1, 1], [], []>} : vector<10x128xf32>, vector<128x128xf32>, vector<10x128xf32> -> vector<10x128xf32>
    %94 = arith.addf %89, %93 : vector<10x128xf32>
    %c0_108 = arith.constant 0 : index
    %c0_109 = arith.constant 0 : index
    %c0_110 = arith.constant 0 : index
    %95 = vector.load %arg8[%c0_108, %c0_109, %c0_110] : memref<1x1x128xf32, #tpu.memory_space<vmem>>, vector<1x1x128xf32>
    %96 = vector.shape_cast %95 : vector<1x1x128xf32> to vector<1x128xf32>
    %97 = vector.broadcast %96 : vector<1x128xf32> to vector<10x128xf32>
    %98 = arith.addf %94, %97 : vector<10x128xf32>
    %cst_111 = arith.constant 0.000000e+00 : f32
    %99 = vector.broadcast %cst_111 : f32 to vector<10x128xf32>
    %100 = arith.maximumf %98, %99 : vector<10x128xf32>
    %c0_112 = arith.constant 0 : index
    %c0_113 = arith.constant 0 : index
    %101 = vector.load %arg9[%c0_112, %c0_113] : memref<10x128xf32, #tpu.memory_space<vmem>>, vector<10x128xf32>
    %102 = arith.mulf %100, %101 : vector<10x128xf32>
    %c1_114 = arith.constant 1 : index
    %c0_115 = arith.constant 0 : index
    %103 = vector.load %arg16[%c1_114, %c0_115] : memref<12x128xf32, #tpu.memory_space<vmem>>, vector<10x128xf32>
    tpu.vector_store %arg16[%c1_114, %c0_115], %102 {strides = array<i32>} : memref<12x128xf32, #tpu.memory_space<vmem>>, vector<10x128xf32>,
    %c0_116 = arith.constant 0 : index
    %c0_117 = arith.constant 0 : index
    %104 = vector.load %arg10[%c0_116, %c0_117] : memref<2x12xf32, #tpu.memory_space<vmem>>, vector<2x12xf32>
    %c0_118 = arith.constant 0 : index
    %c0_119 = arith.constant 0 : index
    %105 = vector.load %arg16[%c0_118, %c0_119] : memref<12x128xf32, #tpu.memory_space<vmem>>, vector<12x128xf32>
    %cst_120 = arith.constant dense<0.000000e+00> : vector<2x128xf32>
    %106 = tpu.matmul %104, %105, %cst_120 {dimension_numbers = #tpu.dot_dimension_numbers<[1], [0], [0], [1], [0, 0, 1, 1], [], []>} : vector<2x12xf32>, vector<12x128xf32>, vector<2x128xf32> -> vector<2x128xf32>
    %c0_121 = arith.constant 0 : index
    %c0_122 = arith.constant 0 : index
    %107 = vector.load %arg11[%c0_121, %c0_122] : memref<1x128xf32, #tpu.memory_space<vmem>>, vector<1x128xf32>
    %108 = vector.broadcast %107 : vector<1x128xf32> to vector<2x128xf32>
    %109 = arith.mulf %106, %108 : vector<2x128xf32>
    %c0_123 = arith.constant 0 : index
    %c0_124 = arith.constant 0 : index
    %110 = vector.load %arg12[%c0_123, %c0_124] : memref<1x128xf32, #tpu.memory_space<vmem>>, vector<1x128xf32>
    %111 = vector.broadcast %110 : vector<1x128xf32> to vector<2x128xf32>
    %112 = arith.addf %109, %111 : vector<2x128xf32>
    %c0_125 = arith.constant 0 : index
    %c0_126 = arith.constant 0 : index
    %113 = vector.load %arg13[%c0_125, %c0_126] : memref<128x128xf32, #tpu.memory_space<vmem>>, vector<128x128xf32>
    %cst_127 = arith.constant dense<0.000000e+00> : vector<2x128xf32>
    %114 = tpu.matmul %112, %113, %cst_127 {dimension_numbers = #tpu.dot_dimension_numbers<[1], [0], [0], [1], [0, 0, 1, 1], [], []>} : vector<2x128xf32>, vector<128x128xf32>, vector<2x128xf32> -> vector<2x128xf32>
    %c0_128 = arith.constant 0 : index
    %c0_129 = arith.constant 0 : index
    %115 = vector.load %arg14[%c0_128, %c0_129] : memref<1x128xf32, #tpu.memory_space<vmem>>, vector<1x128xf32>
    %116 = vector.broadcast %115 : vector<1x128xf32> to vector<2x128xf32>
    %117 = arith.addf %114, %116 : vector<2x128xf32>
    %c0_130 = arith.constant 0 : index
    %c0_131 = arith.constant 0 : index
    %c0_132 = arith.constant 0 : index
    %118 = vector.load %arg15[%c0_130, %c0_131, %c0_132] : memref<1x2x128xf32, #tpu.memory_space<vmem>>, vector<1x2x128xf32>
    %119 = vector.shape_cast %118 : vector<1x2x128xf32> to vector<2x128xf32>
    %120 = vector.shape_cast %117 : vector<2x128xf32> to vector<1x2x128xf32>
    tpu.vector_store %arg15[%c0_130, %c0_131, %c0_132], %120 {strides = array<i32>} : memref<1x2x128xf32, #tpu.memory_space<vmem>>, vector<1x2x128xf32>,
    return
  }
  func.func @transform_0(%arg0: i32) -> (i32, i32, i32) {
    %c0_i32 = arith.constant 0 : i32
    %c0_i32_0 = arith.constant 0 : i32
    %c0_i32_1 = arith.constant 0 : i32
    return %arg0, %c0_i32, %c0_i32_0 : i32, i32, i32
  }
  func.func @transform_1(%arg0: i32) -> (i32, i32, i32) {
    %c0_i32 = arith.constant 0 : i32
    %c0_i32_0 = arith.constant 0 : i32
    %c0_i32_1 = arith.constant 0 : i32
    %c0_i32_2 = arith.constant 0 : i32
    return %c0_i32, %c0_i32_0, %c0_i32_1 : i32, i32, i32
  }
  func.func @transform_2(%arg0: i32) -> (i32, i32) {
    %c0_i32 = arith.constant 0 : i32
    %c0_i32_0 = arith.constant 0 : i32
    %c0_i32_1 = arith.constant 0 : i32
    return %c0_i32, %c0_i32_0 : i32, i32
  }
  func.func @transform_3(%arg0: i32) -> (i32, i32, i32) {
    %c0_i32 = arith.constant 0 : i32
    %c0_i32_0 = arith.constant 0 : i32
    %c0_i32_1 = arith.constant 0 : i32
    %c0_i32_2 = arith.constant 0 : i32
    return %c0_i32, %c0_i32_0, %c0_i32_1 : i32, i32, i32
  }
  func.func @transform_4(%arg0: i32) -> (i32, i32, i32, i32) {
    %c0_i32 = arith.constant 0 : i32
    %c0_i32_0 = arith.constant 0 : i32
    %c0_i32_1 = arith.constant 0 : i32
    %c0_i32_2 = arith.constant 0 : i32
    %c0_i32_3 = arith.constant 0 : i32
    return %c0_i32, %c0_i32_0, %c0_i32_1, %c0_i32_2 : i32, i32, i32, i32
  }
  func.func @transform_5(%arg0: i32) -> (i32, i32, i32) {
    %c0_i32 = arith.constant 0 : i32
    %c0_i32_0 = arith.constant 0 : i32
    %c0_i32_1 = arith.constant 0 : i32
    %c0_i32_2 = arith.constant 0 : i32
    return %c0_i32, %c0_i32_0, %c0_i32_1 : i32, i32, i32
  }
  func.func @transform_6(%arg0: i32) -> (i32, i32, i32, i32) {
    %c0_i32 = arith.constant 0 : i32
    %c0_i32_0 = arith.constant 0 : i32
    %c0_i32_1 = arith.constant 0 : i32
    %c0_i32_2 = arith.constant 0 : i32
    %c0_i32_3 = arith.constant 0 : i32
    return %c0_i32, %c0_i32_0, %c0_i32_1, %c0_i32_2 : i32, i32, i32, i32
  }
  func.func @transform_7(%arg0: i32) -> (i32, i32, i32) {
    %c0_i32 = arith.constant 0 : i32
    %c0_i32_0 = arith.constant 0 : i32
    %c0_i32_1 = arith.constant 0 : i32
    %c0_i32_2 = arith.constant 0 : i32
    return %c0_i32, %c0_i32_0, %c0_i32_1 : i32, i32, i32
  }
  func.func @transform_8(%arg0: i32) -> (i32, i32) {
    %c0_i32 = arith.constant 0 : i32
    %c0_i32_0 = arith.constant 0 : i32
    %c0_i32_1 = arith.constant 0 : i32
    return %c0_i32, %c0_i32_0 : i32, i32
  }
  func.func @transform_9(%arg0: i32) -> (i32, i32) {
    %c0_i32 = arith.constant 0 : i32
    %c0_i32_0 = arith.constant 0 : i32
    %c0_i32_1 = arith.constant 0 : i32
    return %c0_i32, %c0_i32_0 : i32, i32
  }
  func.func @transform_10(%arg0: i32) -> (i32, i32) {
    %c0_i32 = arith.constant 0 : i32
    %c0_i32_0 = arith.constant 0 : i32
    %c0_i32_1 = arith.constant 0 : i32
    return %c0_i32, %c0_i32_0 : i32, i32
  }
  func.func @transform_11(%arg0: i32) -> (i32, i32) {
    %c0_i32 = arith.constant 0 : i32
    %c0_i32_0 = arith.constant 0 : i32
    %c0_i32_1 = arith.constant 0 : i32
    return %c0_i32, %c0_i32_0 : i32, i32
  }
  func.func @transform_12(%arg0: i32) -> (i32, i32) {
    %c0_i32 = arith.constant 0 : i32
    %c0_i32_0 = arith.constant 0 : i32
    %c0_i32_1 = arith.constant 0 : i32
    return %c0_i32, %c0_i32_0 : i32, i32
  }
  func.func @transform_13(%arg0: i32) -> (i32, i32) {
    %c0_i32 = arith.constant 0 : i32
    %c0_i32_0 = arith.constant 0 : i32
    %c0_i32_1 = arith.constant 0 : i32
    return %c0_i32, %c0_i32_0 : i32, i32
  }
  func.func @transform_14(%arg0: i32) -> (i32, i32, i32) {
    %c0_i32 = arith.constant 0 : i32
    %c0_i32_0 = arith.constant 0 : i32
    %c0_i32_1 = arith.constant 0 : i32
    return %arg0, %c0_i32, %c0_i32_0 : i32, i32, i32
  }
}

</mosaic_0001>

<bundles_post_ra>
// kernel: densenet_encoder_forward.1
= control target key start
LH: loop header
LB: loop body
LE: loop exit
PB: predicated region body
PF: predicated region fallthrough
CT: control target
= control target key end

     0   :  { %19 = vsyncpa [#allocation4], 0  ;;  %s1431_s0 = inlined_call_operand.vmem [shape: f32[1,44,128], index: 0, kind: input, shape index: {}]   ;;  %s1432_s1 = inlined_call_operand.hbm [shape: f32[7,128,128], index: 1, kind: input, shape index: {}]   ;;  %s1433_s2 = inlined_call_operand.vmem [shape: f32[1,128], index: 2, kind: input, shape index: {}]   ;;  %s1434_s3 = inlined_call_operand.vmem [shape: f32[3,12,38], index: 3, kind: input, shape index: {}]   ;;  %s1435_s4 = inlined_call_operand.hbm [shape: f32[1,3,128,128], index: 4, kind: input, shape index: {}]   ;;  %s1436_s5 = inlined_call_operand.vmem [shape: f32[1,1,128], index: 5, kind: input, shape index: {}]   ;;  %s1437_s6 = inlined_call_operand.hbm [shape: f32[1,3,128,128], index: 6, kind: input, shape index: {}]   ;;  %s1438_s7 = inlined_call_operand.vmem [shape: f32[1,1,128], index: 7, kind: input, shape index: {}]   ;;  %s1439_s8 = inlined_call_operand.vmem [shape: f32[10,128], index: 8, kind: input, shape index: {}]   ;;  %s1440_s9 = inlined_call_operand.vmem [shape: f32[2,12], index: 9, kind: input, shape index: {}]   ;;  %s1441_s10 = inlined_call_operand.vmem [shape: f32[1,128], index: 10, kind: input, shape index: {}]   ;;  %s1442_s11 = inlined_call_operand.vmem [shape: f32[1,128], index: 11, kind: input, shape index: {}]   ;;  %s1443_s12 = inlined_call_operand.vmem [shape: f32[128,128], index: 12, kind: input, shape index: {}]   ;;  %s1444_s13 = inlined_call_operand.vmem [shape: f32[1,128], index: 13, kind: input, shape index: {}]   ;;  %s1445_s14 = inlined_call_operand.hbm [shape: f32[1,2,128], index: 14, kind: output, shape index: {}]  }
   0x1   :  { %20 = vsyncpa [#allocation7], 0 }
   0x2   :  { %21 = vsyncpa [#allocation5], 0  ;;  %s45_s15 = sshll.u32 %s1435_s4, 4  ;;  %s1128_s16 = smov [#allocation6]   ;;  %s46_s15 = int_to_ptr.hbm [resolvable:$true] %s45_s15 }
   0x3   :  { %s47_s17 = sshll.u32 %s1128_s16, 4  ;;  %s28_s20 = sshll.u32 %s1432_s1, 4  ;;  %s48_s17 = int_to_ptr.vmem [resolvable:$true] %s47_s17  ;;  %s29_s20 = int_to_ptr.hbm [resolvable:$true] %s28_s20 }
   0x4   :  { %s1129_s21 = smov 128   ;;  %s1130_s22 = smov 8  }
   0x5   :  { %53 = dma.hbm_to_vmem [thread:$0]  %s46_s15, 6144, %s48_s17, [#allocation7], %s1129_s21, %s1129_s21, %s1130_s22  }
   0x6   :  { %s1131_s23 = smov [#allocation3]   ;;  %s60_s27 = sshll.u32 %s1437_s6, 4  ;;  %s61_s27 = int_to_ptr.hbm [resolvable:$true] %s60_s27 }
   0x7   :  { %s30_s24 = sshll.u32 %s1131_s23, 4  ;;  %s1132_s4 = smov [#allocation8]   ;;  %s31_s24 = int_to_ptr.vmem [resolvable:$true] %s30_s24 }
   0x8   :  { %36 = dma.hbm_to_vmem [thread:$0]  %s29_s20, 14336, %s31_s24, [#allocation4], %s1129_s21, %s1129_s21, %s1130_s22  }
   0x9   :  { %s62_s28 = sshll.u32 %s1132_s4, 4  ;;  %s63_s28 = int_to_ptr.vmem [resolvable:$true] %s62_s28 }
   0xa   :  { %68 = dma.hbm_to_vmem [thread:$0]  %s61_s27, 6144, %s63_s28, [#allocation7], %s1129_s21, %s1129_s21, %s1130_s22  }
   0xb   :  { %1122 = dma.done.wait [#allocation4], 14336  }
   0xc   :  { %1123 = vsyncadd [#allocation4], 4294952960 }
   0xd   :  { %1124 = dma.done.wait [#allocation7], 12288  }
   0xe   :  { %1125 = vsyncadd [#allocation7], 4294955008  ;;  %v137_v0 = vld [vmem:[#allocation3 + $0xf8] sm:$0xff]  ;;  %v136_v2 = vld [vmem:[#allocation3 + $0xf0] sm:$0xff]  ;;  %vm520_vm0 = vcmask 1045504   ;;  %vm513_vm1 = vcmask 310272  }
   0xf   :  { %v223_v1 = vld [vmem:[#allocation3 + $0x178] sm:$0xff]  ;;  %138 = vmatpush.msra.mxu0 %v137_v0  ;;  %v222_v4 = vld [vmem:[#allocation3 + $0x170] sm:$0xff]  ;;  %v135_v6 = vld [vmem:[#allocation3 + $0xe8] sm:$0xff]  ;;  %vm906_vm2 = vcmask 1043456   ;;  %vm902_vm3 = vcmask 97280   ;;  %s988_s19 = sshll.u32 %s1445_s14, 4  ;;  %s989_s19 = int_to_ptr.hbm [resolvable:$true] %s988_s19 }
  0x10   :  { %224 = vmatpush.msra.mxu2 %v223_v1  ;;  %v115_v3 = vld [vmem:[#allocation3 + $0x78] sm:$0xff]  ;;  %v114_v7 = vld [vmem:[#allocation3 + $0x70] sm:$0xff]  ;;  %v221_v8 = vld [vmem:[#allocation3 + $0x168] sm:$0xff] }
  0x11   :  { %v282_v5 = vld [vmem:[#allocation3 + $0x1f8] sm:$0xff]  ;;  %170 = vmatpush.msra.mxu1 %v115_v3  ;;  %139 = vmatpush.msra.mxu0 %v136_v2  ;;  %v281_v9 = vld [vmem:[#allocation3 + $0x1f0] sm:$0xff]  ;;  %v113_v10 = vld [vmem:[#allocation3 + $0x68] sm:$0xff] }
  0x12   :  { %283 = vmatpush.msra.mxu3 %v282_v5  ;;  %225 = vmatpush.msra.mxu2 %v222_v4  ;;  %v134_v11 = vld [vmem:[#allocation3 + $0xe0] sm:$0xff]  ;;  %v280_v13 = vld [vmem:[#allocation3 + $0x1e8] sm:$0xff]  ;;  %v133_v16 = vld [vmem:[#allocation3 + $0xd8] sm:$0xff] }
  0x13   :  { %171 = vmatpush.msra.mxu1 %v114_v7  ;;  %v220_v12 = vld [vmem:[#allocation3 + $0x160] sm:$0xff]  ;;  %140 = vmatpush.msra.mxu0 %v135_v6  ;;  %v219_v17 = vld [vmem:[#allocation3 + $0x158] sm:$0xff]  ;;  %v132_v20 = vld [vmem:[#allocation3 + $0xd0] sm:$0xff] }
  0x14   :  { %284 = vmatpush.msra.mxu3 %v281_v9  ;;  %226 = vmatpush.msra.mxu2 %v221_v8  ;;  %v112_v14 = vld [vmem:[#allocation3 + $0x60] sm:$0xff]  ;;  %v111_v18 = vld [vmem:[#allocation3 + $0x58] sm:$0xff]  ;;  %v218_v21 = vld [vmem:[#allocation3 + $0x150] sm:$0xff] }
  0x15   :  { %v279_v15 = vld [vmem:[#allocation3 + $0x1e0] sm:$0xff]  ;;  %172 = vmatpush.msra.mxu1 %v113_v10  ;;  %141 = vmatpush.msra.mxu0 %v134_v11  ;;  %v278_v19 = vld [vmem:[#allocation3 + $0x1d8] sm:$0xff]  ;;  %v110_v22 = vld [vmem:[#allocation3 + $0x50] sm:$0xff] }
  0x16   :  { %285 = vmatpush.msra.mxu3 %v280_v13  ;;  %227 = vmatpush.msra.mxu2 %v220_v12  ;;  %v277_v23 = vld [vmem:[#allocation3 + $0x1d0] sm:$0xff]  ;;  %v131_v24 = vld [vmem:[#allocation3 + $0xc8] sm:$0xff]  ;;  %v130_v28 = vld [vmem:[#allocation3 + $0xc0] sm:$0xff] }
  0x17   :  { %173 = vmatpush.msra.mxu1 %v112_v14  ;;  %142 = vmatpush.msra.mxu0 %v133_v16  ;;  %v217_v25 = vld [vmem:[#allocation3 + $0x148] sm:$0xff]  ;;  %v216_v29 = vld [vmem:[#allocation3 + $0x140] sm:$0xff]  ;;  %v129_v32 = vld [vmem:[#allocation3 + $0xb8] sm:$0xff] }
  0x18   :  { %286 = vmatpush.msra.mxu3 %v279_v15  ;;  %228 = vmatpush.msra.mxu2 %v219_v17  ;;  %v109_v26 = vld [vmem:[#allocation3 + $0x48] sm:$0xff]  ;;  %v108_v30 = vld [vmem:[#allocation3 + $0x40] sm:$0xff]  ;;  %v215_v33 = vld [vmem:[#allocation3 + $0x138] sm:$0xff] }
  0x19   :  { %174 = vmatpush.msra.mxu1 %v111_v18  ;;  %143 = vmatpush.msra.mxu0 %v132_v20  ;;  %v276_v27 = vld [vmem:[#allocation3 + $0x1c8] sm:$0xff]  ;;  %v275_v31 = vld [vmem:[#allocation3 + $0x1c0] sm:$0xff]  ;;  %v107_v34 = vld [vmem:[#allocation3 + $0x38] sm:$0xff] }
  0x1a   :  { %287 = vmatpush.msra.mxu3 %v278_v19  ;;  %229 = vmatpush.msra.mxu2 %v218_v21  ;;  %v274_v35 = vld [vmem:[#allocation3 + $0x1b8] sm:$0xff]  ;;  %v128_v36 = vld [vmem:[#allocation3 + $0xb0] sm:$0xff]  ;;  %v127_v40 = vld [vmem:[#allocation3 + $0xa8] sm:$0xff] }
  0x1b   :  { %175 = vmatpush.msra.mxu1 %v110_v22  ;;  %144 = vmatpush.msra.mxu0 %v131_v24  ;;  %v214_v37 = vld [vmem:[#allocation3 + $0x130] sm:$0xff]  ;;  %v213_v41 = vld [vmem:[#allocation3 + $0x128] sm:$0xff]  ;;  %v126_v44 = vld [vmem:[#allocation3 + $0xa0] sm:$0xff] }
  0x1c   :  { %288 = vmatpush.msra.mxu3 %v277_v23  ;;  %230 = vmatpush.msra.mxu2 %v217_v25  ;;  %v106_v38 = vld [vmem:[#allocation3 + $0x30] sm:$0xff]  ;;  %v105_v42 = vld [vmem:[#allocation3 + $0x28] sm:$0xff]  ;;  %v212_v45 = vld [vmem:[#allocation3 + $0x120] sm:$0xff] }
  0x1d   :  { %176 = vmatpush.msra.mxu1 %v109_v26  ;;  %145 = vmatpush.msra.mxu0 %v130_v28  ;;  %v273_v39 = vld [vmem:[#allocation3 + $0x1b0] sm:$0xff]  ;;  %v272_v43 = vld [vmem:[#allocation3 + $0x1a8] sm:$0xff]  ;;  %v104_v46 = vld [vmem:[#allocation3 + $0x20] sm:$0xff] }
  0x1e   :  { %289 = vmatpush.msra.mxu3 %v276_v27  ;;  %231 = vmatpush.msra.mxu2 %v216_v29  ;;  %v271_v47 = vld [vmem:[#allocation3 + $0x1a0] sm:$0xff]  ;;  %v125_v48 = vld [vmem:[#allocation3 + $0x98] sm:$0xff]  ;;  %v124_v52 = vld [vmem:[#allocation3 + $0x90] sm:$0xff] }
  0x1f   :  { %177 = vmatpush.msra.mxu1 %v108_v30  ;;  %146 = vmatpush.msra.mxu0 %v129_v32  ;;  %v211_v49 = vld [vmem:[#allocation3 + $0x118] sm:$0xff]  ;;  %v210_v53 = vld [vmem:[#allocation3 + $0x110] sm:$0xff]  ;;  %v123_v56 = vld [vmem:[#allocation3 + $0x88] sm:$0xff] }
  0x20   :  { %290 = vmatpush.msra.mxu3 %v275_v31  ;;  %232 = vmatpush.msra.mxu2 %v215_v33  ;;  %v103_v50 = vld [vmem:[#allocation3 + $0x18] sm:$0xff]  ;;  %v102_v54 = vld [vmem:[#allocation3 + $0x10] sm:$0xff]  ;;  %v209_v57 = vld [vmem:[#allocation3 + $0x108] sm:$0xff] }
  0x21   :  { %178 = vmatpush.msra.mxu1 %v107_v34  ;;  %147 = vmatpush.msra.mxu0 %v128_v36  ;;  %v270_v51 = vld [vmem:[#allocation3 + $0x198] sm:$0xff]  ;;  %v269_v55 = vld [vmem:[#allocation3 + $0x190] sm:$0xff]  ;;  %v101_v58 = vld [vmem:[#allocation3 + $0x8] sm:$0xff] }
  0x22   :  { %291 = vmatpush.msra.mxu3 %v274_v35  ;;  %233 = vmatpush.msra.mxu2 %v214_v37  ;;  %v268_v59 = vld [vmem:[#allocation3 + $0x188] sm:$0xff]  ;;  %v122_v60 = vld [vmem:[#allocation3 + $0x80] sm:$0xff]  ;;  %v116_v62 = vld [vmem:[%s1431_s0 + $0x1] sm:$0xff] }
  0x23   :  { %179 = vmatpush.msra.mxu1 %v106_v38  ;;  %148 = vmatpush.msra.mxu0 %v127_v40  ;;  %v208_v61 = vld [vmem:[#allocation3 + $0x100] sm:$0xff]  ;;  %v202_v63 = vld [vmem:[%s1431_s0 + $0x2] sm:$0xff]  ;;  %v339_v10 = vld [vmem:[#allocation3 + $0x268] sm:$0xff] }
  0x24   :  { %292 = vmatpush.msra.mxu3 %v273_v39  ;;  %234 = vmatpush.msra.mxu2 %v213_v41  ;;  %v100_v0 = vld [vmem:[#allocation3] sm:$0xff]  ;;  %v95_v2 = vld [vmem:[%s1431_s0] sm:$0xff]  ;;  %v341_v4 = vld [vmem:[#allocation3 + $0x278] sm:$0xff] }
  0x25   :  { %180 = vmatpush.msra.mxu1 %v105_v42  ;;  %149 = vmatpush.msra.mxu0 %v126_v44  ;;  %v267_v1 = vld [vmem:[#allocation3 + $0x180] sm:$0xff]  ;;  %v261_v3 = vld [vmem:[%s1431_s0 + $0x3] sm:$0xff]  ;;  %v457_v11 = vld [vmem:[#allocation3 + $0x368] sm:$0xff] }
  0x26   :  { %293 = vmatpush.msra.mxu3 %v272_v43  ;;  %235 = vmatpush.msra.mxu2 %v212_v45  ;;  %v459_v5 = vld [vmem:[#allocation3 + $0x378] sm:$0xff]  ;;  %v340_v7 = vld [vmem:[#allocation3 + $0x270] sm:$0xff]  ;;  %v338_v14 = vld [vmem:[#allocation3 + $0x260] sm:$0xff] }
  0x27   :  { %181 = vmatpush.msra.mxu1 %v104_v46  ;;  %150 = vmatpush.msra.mxu0 %v125_v48  ;;  %v400_v6 = vld [vmem:[#allocation3 + $0x2f8] sm:$0xff]  ;;  %v458_v8 = vld [vmem:[#allocation3 + $0x370] sm:$0xff]  ;;  %v398_v15 = vld [vmem:[#allocation3 + $0x2e8] sm:$0xff] }
  0x28   :  { %294 = vmatpush.msra.mxu3 %v271_v47  ;;  %236 = vmatpush.msra.mxu2 %v211_v49  ;;  %v399_v9 = vld [vmem:[#allocation3 + $0x2f0] sm:$0xff]  ;;  %v117_v12 = vld [vmem:[%s1431_s0 + $0x9] sm:$0xff]  ;;  %v118_v23 = vld [vmem:[%s1431_s0 + $0x11] sm:$0xff] }
  0x29   :  { %182 = vmatpush.msra.mxu1 %v103_v50  ;;  %151 = vmatpush.msra.mxu0 %v124_v52  ;;  %v203_v13 = vld [vmem:[%s1431_s0 + $0xa] sm:$0xff]  ;;  %v336_v22 = vld [vmem:[#allocation3 + $0x250] sm:$0xff]  ;;  %v204_v24 = vld [vmem:[%s1431_s0 + $0x12] sm:$0xff] }
  0x2a   :  { %295 = vmatpush.msra.mxu3 %v270_v51  ;;  %237 = vmatpush.msra.mxu2 %v210_v53  ;;  %v96_v16 = vld [vmem:[%s1431_s0 + $0x8] sm:$0xff]  ;;  %v456_v18 = vld [vmem:[#allocation3 + $0x360] sm:$0xff]  ;;  %v454_v26 = vld [vmem:[#allocation3 + $0x350] sm:$0xff] }
  0x2b   :  { %183 = vmatpush.msra.mxu1 %v102_v54  ;;  %152 = vmatpush.msra.mxu0 %v123_v56  ;;  %v262_v17 = vld [vmem:[%s1431_s0 + $0xb] sm:$0xff]  ;;  %v335_v27 = vld [vmem:[#allocation3 + $0x248] sm:$0xff]  ;;  %v395_v28 = vld [vmem:[#allocation3 + $0x2d0] sm:$0xff] }
  0x2c   :  { %296 = vmatpush.msra.mxu3 %v269_v55  ;;  %238 = vmatpush.msra.mxu2 %v209_v57  ;;  %v337_v19 = vld [vmem:[#allocation3 + $0x258] sm:$0xff]  ;;  %v397_v20 = vld [vmem:[#allocation3 + $0x2e0] sm:$0xff]  ;;  %v453_v29 = vld [vmem:[#allocation3 + $0x348] sm:$0xff] }
  0x2d   :  { %184 = vmatpush.msra.mxu1 %v101_v58  ;;  %153 = vmatpush.msra.mxu0 %v122_v60  ;;  %v455_v21 = vld [vmem:[#allocation3 + $0x358] sm:$0xff]  ;;  %v97_v30 = vld [vmem:[%s1431_s0 + $0x10] sm:$0xff]  ;;  %v394_v33 = vld [vmem:[#allocation3 + $0x2c8] sm:$0xff] }
  0x2e   :  { %297 = vmatpush.msra.mxu3 %v268_v59  ;;  %239 = vmatpush.msra.mxu2 %v208_v61  ;;  %v396_v25 = vld [vmem:[#allocation3 + $0x2d8] sm:$0xff]  ;;  %v263_v31 = vld [vmem:[%s1431_s0 + $0x13] sm:$0xff]  ;;  %v332_v38 = vld [vmem:[#allocation3 + $0x230] sm:$0xff] }
  0x2f   :  { %154 = vmatmul.f32.vlgmr.msra.gmra.mxu0 %v116_v62  ;;  %240 = vmatmul.f32.vlgmr.msra.gmra.mxu2 %v202_v63  ;;  %v334_v32 = vld [vmem:[#allocation3 + $0x240] sm:$0xff]  ;;  %v333_v35 = vld [vmem:[#allocation3 + $0x238] sm:$0xff]  ;;  %v119_v40 = vld [vmem:[%s1431_s0 + $0x19] sm:$0xff] }
  0x30   :  { %185 = vmatpush.msra.mxu1 %v100_v0  ;;  %298 = vmatpush.msra.mxu3 %v267_v1  ;;  %v452_v34 = vld [vmem:[#allocation3 + $0x340] sm:$0xff]  ;;  %v451_v37 = vld [vmem:[#allocation3 + $0x338] sm:$0xff]  ;;  %v205_v41 = vld [vmem:[%s1431_s0 + $0x1a] sm:$0xff] }
  0x31   :  { %186 = vmatmul.f32.vlgmr.msra.gmra.mxu1 %v95_v2  ;;  %299 = vmatmul.f32.vlgmr.msra.gmra.mxu3 %v261_v3  ;;  %v393_v36 = vld [vmem:[#allocation3 + $0x2c0] sm:$0xff]  ;;  %v392_v39 = vld [vmem:[#allocation3 + $0x2b8] sm:$0xff]  ;;  %v450_v42 = vld [vmem:[#allocation3 + $0x330] sm:$0xff] }
  0x32   :  { %342 = vmatpush.msrb.mxu0 %v341_v4  ;;  %460 = vmatpush.msrb.mxu2 %v459_v5  ;;  %v331_v43 = vld [vmem:[#allocation3 + $0x228] sm:$0xff]  ;;  %v391_v46 = vld [vmem:[#allocation3 + $0x2b0] sm:$0xff]  ;;  %v330_v48 = vld [vmem:[#allocation3 + $0x220] sm:$0xff] }
  0x33   :  { %401 = vmatpush.msrb.mxu1 %v400_v6  ;;  %v98_v44 = vld [vmem:[%s1431_s0 + $0x18] sm:$0xff]  ;;  %v448_v50 = vld [vmem:[#allocation3 + $0x320] sm:$0xff]  ;;  %v329_v51 = vld [vmem:[#allocation3 + $0x218] sm:$0xff] }
  0x34   :  { %343 = vmatpush.msrb.mxu0 %v340_v7  ;;  %461 = vmatpush.msrb.mxu2 %v458_v8  ;;  %v264_v45 = vld [vmem:[%s1431_s0 + $0x1b] sm:$0xff]  ;;  %v389_v52 = vld [vmem:[#allocation3 + $0x2a0] sm:$0xff]  ;;  %v447_v53 = vld [vmem:[#allocation3 + $0x318] sm:$0xff] }
  0x35   :  { %402 = vmatpush.msrb.mxu1 %v399_v9  ;;  %v449_v47 = vld [vmem:[#allocation3 + $0x328] sm:$0xff]  ;;  %v120_v54 = vld [vmem:[%s1431_s0 + $0x21] sm:$0x3f]  ;;  %v388_v57 = vld [vmem:[#allocation3 + $0x298] sm:$0xff] }
  0x36   :  { %344 = vmatpush.msrb.mxu0 %v339_v10  ;;  %462 = vmatpush.msrb.mxu2 %v457_v11  ;;  %v390_v49 = vld [vmem:[#allocation3 + $0x2a8] sm:$0xff]  ;;  %v206_v55 = vld [vmem:[%s1431_s0 + $0x22] sm:$0x3f]  ;;  %v326_v0 = vld [vmem:[#allocation3 + $0x200] sm:$0xff] }
  0x37   :  { %157 = vmatmul.f32.gmra.mxu0 %v117_v12  ;;  %243 = vmatmul.f32.gmra.mxu2 %v203_v13  ;;  %v328_v56 = vld [vmem:[#allocation3 + $0x210] sm:$0xff]  ;;  %v327_v61 = vld [vmem:[#allocation3 + $0x208] sm:$0xff]  ;;  %v444_v2 = vld [vmem:[#allocation3 + $0x300] sm:$0xff] }
  0x38   :  { %345 = vmatpush.msrb.mxu0 %v338_v14  ;;  %403 = vmatpush.msrb.mxu1 %v398_v15  ;;  %v99_v58 = vld [vmem:[%s1431_s0 + $0x20] sm:$0x3f]  ;;  %v445_v63 = vld [vmem:[#allocation3 + $0x308] sm:$0xff]  ;;  %v438_v4 = vld [vmem:[%s1431_s0 + $0x6] sm:$0xff] }
  0x39   :  { %189 = vmatmul.f32.gmra.mxu1 %v96_v16  ;;  %302 = vmatmul.f32.gmra.mxu3 %v262_v17  ;;  %v265_v59 = vld [vmem:[%s1431_s0 + $0x23] sm:$0x3f]  ;;  %v386_v1 = vld [vmem:[#allocation3 + $0x288] sm:$0xff]  ;;  %v385_v5 = vld [vmem:[#allocation3 + $0x280] sm:$0xff] }
  0x3a   :  { %463 = vmatpush.msrb.mxu2 %v456_v18  ;;  %346 = vmatpush.msrb.mxu0 %v337_v19  ;;  %v446_v60 = vld [vmem:[#allocation3 + $0x310] sm:$0xff]  ;;  %v321_v7 = vld [vmem:[%s1431_s0 + $0xc] sm:$0xff]  ;;  %v322_v10 = vld [vmem:[%s1431_s0 + $0x14] sm:$0xff] }
  0x3b   :  { %404 = vmatpush.msrb.mxu1 %v397_v20  ;;  %v387_v62 = vld [vmem:[#allocation3 + $0x290] sm:$0xff]  ;;  %v439_v8 = vld [vmem:[%s1431_s0 + $0xe] sm:$0xff]  ;;  %v440_v11 = vld [vmem:[%s1431_s0 + $0x16] sm:$0xff] }
  0x3c   :  { %464 = vmatpush.msrb.mxu2 %v455_v21  ;;  %347 = vmatpush.msrb.mxu0 %v336_v22  ;;  %v320_v3 = vld [vmem:[%s1431_s0 + $0x4] sm:$0xff]  ;;  %v380_v9 = vld [vmem:[%s1431_s0 + $0xd] sm:$0xff]  ;;  %v381_v12 = vld [vmem:[%s1431_s0 + $0x15] sm:$0xff] }
  0x3d   :  { %405 = vmatpush.msrb.mxu1 %v396_v25  ;;  %v379_v6 = vld [vmem:[%s1431_s0 + $0x5] sm:$0xff]  ;;  %v323_v13 = vld [vmem:[%s1431_s0 + $0x1c] sm:$0xff] }
  0x3e   :  { %465 = vmatpush.msrb.mxu2 %v454_v26  ;;  %348 = vmatpush.msrb.mxu0 %v335_v27  ;;  %v441_v14 = vld [vmem:[%s1431_s0 + $0x1e] sm:$0xff]  ;;  %v442_v17 = vld [vmem:[%s1431_s0 + $0x26] sm:$0x3f] }
  0x3f   :  { %160 = vmatmul.f32.gmra.mxu0 %v118_v23  ;;  %246 = vmatmul.f32.gmra.mxu2 %v204_v24  ;;  %v382_v15 = vld [vmem:[%s1431_s0 + $0x1d] sm:$0xff]  ;;  %v383_v18 = vld [vmem:[%s1431_s0 + $0x25] sm:$0x3f] }
  0x40   :  { %406 = vmatpush.msrb.mxu1 %v395_v28  ;;  %466 = vmatpush.msrb.mxu2 %v453_v29  ;;  %v324_v16 = vld [vmem:[%s1431_s0 + $0x24] sm:$0x3f] }
  0x41   :  { %192 = vmatmul.f32.gmra.mxu1 %v97_v30  ;;  %305 = vmatmul.f32.gmra.mxu3 %v263_v31 }
  0x42   :  { %349 = vmatpush.msrb.mxu0 %v334_v32  ;;  %407 = vmatpush.msrb.mxu1 %v394_v33 }
  0x43   :  { %467 = vmatpush.msrb.mxu2 %v452_v34 }
  0x44   :  { %350 = vmatpush.msrb.mxu0 %v333_v35  ;;  %408 = vmatpush.msrb.mxu1 %v393_v36 }
  0x45   :  { %468 = vmatpush.msrb.mxu2 %v451_v37 }
  0x46   :  { %351 = vmatpush.msrb.mxu0 %v332_v38  ;;  %409 = vmatpush.msrb.mxu1 %v392_v39 }
  0x47   :  { %163 = vmatmul.f32.gmra.mxu0 %v119_v40  ;;  %249 = vmatmul.f32.gmra.mxu2 %v205_v41 }
  0x48   :  { %469 = vmatpush.msrb.mxu2 %v450_v42  ;;  %352 = vmatpush.msrb.mxu0 %v331_v43 }
  0x49   :  { %195 = vmatmul.f32.gmra.mxu1 %v98_v44  ;;  %308 = vmatmul.f32.gmra.mxu3 %v264_v45 }
  0x4a   :  { %410 = vmatpush.msrb.mxu1 %v391_v46  ;;  %470 = vmatpush.msrb.mxu2 %v449_v47 }
  0x4b   :  { %353 = vmatpush.msrb.mxu0 %v330_v48 }
  0x4c   :  { %411 = vmatpush.msrb.mxu1 %v390_v49  ;;  %471 = vmatpush.msrb.mxu2 %v448_v50 }
  0x4d   :  { %354 = vmatpush.msrb.mxu0 %v329_v51 }
  0x4e   :  { %412 = vmatpush.msrb.mxu1 %v389_v52  ;;  %472 = vmatpush.msrb.mxu2 %v447_v53 }
  0x4f   :  { %166 = vmatmul.f32.gmra.mxu0 %v120_v54  ;;  %252 = vmatmul.f32.gmra.mxu2 %v206_v55 }
  0x50   :  { %355 = vmatpush.msrb.mxu0 %v328_v56  ;;  %413 = vmatpush.msrb.mxu1 %v388_v57 }
  0x51   :  { %198 = vmatmul.f32.gmra.mxu1 %v99_v58  ;;  %311 = vmatmul.f32.gmra.mxu3 %v265_v59 }
  0x52   :  { %473 = vmatpush.msrb.mxu2 %v446_v60  ;;  %356 = vmatpush.msrb.mxu0 %v327_v61 }
  0x53   :  { %414 = vmatpush.msrb.mxu1 %v387_v62 }
  0x54   :  { %474 = vmatpush.msrb.mxu2 %v445_v63  ;;  %357 = vmatpush.msrb.mxu0 %v326_v0 }
  0x55   :  { %415 = vmatpush.msrb.mxu1 %v386_v1 }
  0x56   :  { %475 = vmatpush.msrb.mxu2 %v444_v2 }
  0x57   :  { %358 = vmatmul.f32.vlgmr.msrb.gmra.mxu0 %v320_v3  ;;  %476 = vmatmul.f32.vlgmr.msrb.gmra.mxu2 %v438_v4 }
  0x58   :  { %416 = vmatpush.msrb.mxu1 %v385_v5 }
  0x59   :  { %417 = vmatmul.f32.vlgmr.msrb.gmra.mxu1 %v379_v6 }
  0x5f   :  { %361 = vmatmul.f32.gmra.mxu0 %v321_v7  ;;  %479 = vmatmul.f32.gmra.mxu2 %v439_v8 }
  0x61   :  { %420 = vmatmul.f32.gmra.mxu1 %v380_v9 }
  0x67   :  { %364 = vmatmul.f32.gmra.mxu0 %v322_v10  ;;  %482 = vmatmul.f32.gmra.mxu2 %v440_v11 }
  0x69   :  { %423 = vmatmul.f32.gmra.mxu1 %v381_v12 }
  0x6f   :  { %367 = vmatmul.f32.gmra.mxu0 %v323_v13  ;;  %485 = vmatmul.f32.gmra.mxu2 %v441_v14  ;;  %v1020_v14 = vld [vmem:[%s1433_s2] ss:$0 sm:$0xff] }
  0x71   :  { %426 = vmatmul.f32.gmra.mxu1 %v382_v15 }
  0x77   :  { %370 = vmatmul.f32.gmra.mxu0 %v324_v16  ;;  %488 = vmatmul.f32.gmra.mxu2 %v442_v17 }
  0x79   :  { %429 = vmatmul.f32.gmra.mxu1 %v383_v18 }
  0xac   :  { %v155_v19 = vpop.f32.mrf.mxu0 }
  0xae   :  { %v187_v20 = vpop.f32.mrf.mxu1 }
  0xaf   :  { %v188_v21 = vadd.f32 %v187_v20, %v155_v19 }
  0xb2   :  { %v241_v22 = vpop.f32.mrf.mxu2 }
  0xb3   :  { %v256_v23 = vadd.f32 %v241_v22, %v188_v21 }
  0xb4   :  { %v158_v24 = vpop.f32.mrf.mxu0  ;;  %v300_v32 = vpop.f32.mrf.mxu3 }
  0xb5   :  { %v315_v6 = vadd.f32 %v300_v32, %v256_v23  ;;  %v512_v32 = vld [vmem:[%s1434_s3 + $0x8] sm:$0xf] }
  0xb6   :  { %v190_v25 = vpop.f32.mrf.mxu1 }
  0xb7   :  { %v191_v55 = vadd.f32 %v190_v25, %v158_v24 }
  0xba   :  { %v244_v26 = vpop.f32.mrf.mxu2 }
  0xbb   :  { %v257_v59 = vadd.f32 %v244_v26, %v191_v55  ;;  %v715_v55 = vld [vmem:[#allocation6 + $0x160] sm:$0xff] }
  0xbc   :  { %v161_v27 = vpop.f32.mrf.mxu0  ;;  %v303_v36 = vpop.f32.mrf.mxu3 }
  0xbd   :  { %v316_v2 = vadd.f32 %v303_v36, %v257_v59  ;;  %v1008_v36 = vld [vmem:[%s1434_s3 + $0x28] sm:$0xf]  ;;  %v713_v59 = vld [vmem:[#allocation6 + $0x150] sm:$0xff] }
  0xbe   :  { %v193_v28 = vpop.f32.mrf.mxu1 }
  0xbf   :  { %v194_v51 = vadd.f32 %v193_v28, %v161_v27 }
  0xc2   :  { %v247_v29 = vpop.f32.mrf.mxu2 }
  0xc3   :  { %v258_v56 = vadd.f32 %v247_v29, %v194_v51  ;;  %v651_v51 = vld [vmem:[#allocation6 + $0xe8] sm:$0xff] }
  0xc4   :  { %v164_v30 = vpop.f32.mrf.mxu0  ;;  %v306_v41 = vpop.f32.mrf.mxu3 }
  0xc5   :  { %v317_v62 = vadd.f32 %v306_v41, %v258_v56  ;;  %v630_v41 = vld [vmem:[#allocation6 + $0x58] sm:$0xff] }
  0xc6   :  { %v196_v31 = vpop.f32.mrf.mxu1  ;;  %v649_v56 = vld [vmem:[#allocation6 + $0xd8] sm:$0xff] }
  0xc7   :  { %v197_v49 = vadd.f32 %v196_v31, %v164_v30  ;;  %v511_v31 = vld [vmem:[%s1434_s3] sm:$0xff] }
  0xca   :  { %v250_v33 = vpop.f32.mrf.mxu2 }
  0xcb   :  { %v259_v52 = vadd.f32 %v250_v33, %v197_v49  ;;  %v1002_v33 = vld [vmem:[%s1434_s3 + $0x10] sm:$0xff]  ;;  %v626_v49 = vld [vmem:[#allocation6 + $0x38] sm:$0xff] }
  0xcc   :  { %v167_v34 = vpop.f32.mrf.mxu0  ;;  %v309_v46 = vpop.f32.mrf.mxu3 }
  0xcd   :  { %v318_v60 = vadd.f32 %v309_v46, %v259_v52  ;;  %v652_v46 = vld [vmem:[#allocation6 + $0xf0] sm:$0xff]  ;;  %v716_v52 = vld [vmem:[#allocation6 + $0x168] sm:$0xff] }
  0xce   :  { %v199_v35 = vpop.f32.mrf.mxu1 }
  0xcf   :  { %v200_v53 = vadd.f32 %v199_v35, %v167_v34  ;;  %v1003_v34 = vld [vmem:[%s1434_s3 + $0x18] sm:$0xf]  ;;  %v1007_v35 = vld [vmem:[%s1434_s3 + $0x20] sm:$0xff]  ;;  %s1133_s3 = smov [#allocation9]  }
  0xd0   :  { %s986_s17 = sshll.u32 %s1133_s3, 4  ;;  %s987_s17 = int_to_ptr.vmem [resolvable:$true] %s986_s17 }
  0xd2   :  { %v253_v37 = vpop.f32.mrf.mxu2 }
  0xd3   :  { %v260_v57 = vadd.f32 %v253_v37, %v200_v53  ;;  %v634_v37 = vld [vmem:[#allocation6 + $0x78] sm:$0xff]  ;;  %v624_v53 = vld [vmem:[#allocation6 + $0x28] sm:$0xff] }
  0xd4   :  { %v359_v38 = vpop.f32.mrf.mxu0  ;;  %v312_v58 = vpop.f32.mrf.mxu3  ;;  %677 = vmatpush.msra.mxu1 %v634_v37  ;;  %v775_v37 = vld [vmem:[#allocation8 + $0x78] sm:$0xff] }
  0xd5   :  { %v319_v63 = vadd.f32 %v312_v58, %v260_v57  ;;  %v374_v9 = vadd.f32 %v359_v38, %v315_v6  ;;  %v633_v38 = vld [vmem:[#allocation6 + $0x70] sm:$0xff]  ;;  %v714_v57 = vld [vmem:[#allocation6 + $0x158] sm:$0xff] }
  0xd6   :  { %v418_v39 = vpop.f32.mrf.mxu1  ;;  %678 = vmatpush.msra.mxu1 %v633_v38  ;;  %v648_v58 = vld [vmem:[#allocation6 + $0xd0] sm:$0xff]  ;;  %v645_v6 = vld [vmem:[#allocation6 + $0xb8] sm:$0xff] }
  0xd7   :  { %v433_v18 = vadd.f32 %v418_v39, %v374_v9  ;;  %v632_v39 = vld [vmem:[#allocation6 + $0x68] sm:$0xff]  ;;  %v709_v9 = vld [vmem:[#allocation6 + $0x130] sm:$0xff] }
  0xd8   :  { %679 = vmatpush.msra.mxu1 %v632_v39  ;;  %v793_v38 = vld [vmem:[#allocation8 + $0xf0] sm:$0xff] }
  0xd9   :  { %v774_v39 = vld [vmem:[#allocation8 + $0x70] sm:$0xff] }
  0xda   :  { %v477_v40 = vpop.f32.mrf.mxu2 }
  0xdb   :  { %v492_v22 = vadd.f32 %v477_v40, %v433_v18  ;;  %v631_v40 = vld [vmem:[#allocation6 + $0x60] sm:$0xff]  ;;  %v705_v18 = vld [vmem:[#allocation6 + $0x110] sm:$0xff] }
  0xdc   :  { %v362_v42 = vpop.f32.mrf.mxu0  ;;  %680 = vmatpush.msra.mxu1 %v631_v40  ;;  %v792_v40 = vld [vmem:[#allocation8 + $0xe8] sm:$0xff] }
  0xdd   :  { %v375_v7 = vadd.f32 %v362_v42, %v316_v2  ;;  %v501_v27 = vadd.f32 %v1020_v14, %v492_v22  ;;  %v629_v42 = vld [vmem:[#allocation6 + $0x50] sm:$0xff]  ;;  %v620_v2 = vld [vmem:[#allocation6 + $0x8] sm:$0xff]  ;;  %v703_v22 = vld [vmem:[#allocation6 + $0x100] sm:$0xff] }
  0xde   :  { %v421_v43 = vpop.f32.mrf.mxu1  ;;  %681 = vmatpush.msra.mxu1 %v630_v41  ;;  %v773_v41 = vld [vmem:[#allocation8 + $0x68] sm:$0xff] }
  0xdf   :  { %v434_v15 = vadd.f32 %v421_v43, %v375_v7  ;;  %v506_v30 = vmax.f32 %v501_v27, 0.0  ;;  %v628_v43 = vld [vmem:[#allocation6 + $0x48] sm:$0xff]  ;;  %v710_v7 = vld [vmem:[#allocation6 + $0x138] sm:$0xff] }
  0xe0   :  { %682 = vmatpush.msra.mxu1 %v629_v42  ;;  %v791_v42 = vld [vmem:[#allocation8 + $0xe0] sm:$0xff] }
  0xe2   :  { %v480_v44 = vpop.f32.mrf.mxu2  ;;  %683 = vmatpush.msra.mxu1 %v628_v43  ;;  %v772_v43 = vld [vmem:[#allocation8 + $0x60] sm:$0xff] }
  0xe3   :  { %v493_v19 = vadd.f32 %v480_v44, %v434_v15  ;;  %v653_v44 = vld [vmem:[#allocation6 + $0xf8] sm:$0xff] }
  0xe4   :  { %v365_v45 = vpop.f32.mrf.mxu0  ;;  %654 = vmatpush.msra.mxu0 %v653_v44  ;;  %v641_v15 = vld [vmem:[#allocation6 + $0x98] sm:$0xff] }
  0xe5   :  { %v376_v3 = vadd.f32 %v365_v45, %v317_v62  ;;  %v502_v25 = vadd.f32 %v1020_v14, %v493_v19  ;;  %v718_v45 = vld [vmem:[#allocation6 + $0x178] sm:$0xff]  ;;  %v621_v62 = vld [vmem:[#allocation6 + $0x10] sm:$0xff]  ;;  %v639_v19 = vld [vmem:[#allocation6 + $0x88] sm:$0xff] }
  0xe6   :  { %v424_v47 = vpop.f32.mrf.mxu1  ;;  %719 = vmatpush.msra.mxu2 %v718_v45  ;;  %655 = vmatpush.msra.mxu0 %v652_v46  ;;  %v790_v44 = vld [vmem:[#allocation8 + $0xd8] sm:$0xff]  ;;  %v789_v45 = vld [vmem:[#allocation8 + $0xd0] sm:$0xff]  ;;  %v788_v46 = vld [vmem:[#allocation8 + $0xc8] sm:$0xff] }
  0xe7   :  { %v435_v10 = vadd.f32 %v424_v47, %v376_v3  ;;  %v507_v29 = vmax.f32 %v502_v25, 0.0  ;;  %v717_v47 = vld [vmem:[#allocation6 + $0x170] sm:$0xff]  ;;  %v646_v3 = vld [vmem:[#allocation6 + $0xc0] sm:$0xff] }
  0xe8   :  { %720 = vmatpush.msra.mxu2 %v717_v47  ;;  %656 = vmatpush.msra.mxu0 %v651_v51  ;;  %v787_v47 = vld [vmem:[#allocation8 + $0xc0] sm:$0xff]  ;;  %v770_v51 = vld [vmem:[#allocation8 + $0x50] sm:$0xff] }
  0xea   :  { %v483_v48 = vpop.f32.mrf.mxu2  ;;  %721 = vmatpush.msra.mxu2 %v716_v52  ;;  %v858_v52 = vld [vmem:[#allocation8 + $0x170] sm:$0xff] }
  0xeb   :  { %v494_v16 = vadd.f32 %v483_v48, %v435_v10  ;;  %v627_v48 = vld [vmem:[#allocation6 + $0x40] sm:$0xff] }
  0xec   :  { %v368_v50 = vpop.f32.mrf.mxu0  ;;  %684 = vmatpush.msra.mxu1 %v627_v48  ;;  %722 = vmatpush.msra.mxu2 %v715_v55  ;;  %v771_v48 = vld [vmem:[#allocation8 + $0x58] sm:$0xff]  ;;  %v785_v55 = vld [vmem:[#allocation8 + $0xb0] sm:$0xff] }
  0xed   :  { %v377_v0 = vadd.f32 %v368_v50, %v318_v60  ;;  %v503_v23 = vadd.f32 %v1020_v14, %v494_v16  ;;  %v625_v50 = vld [vmem:[#allocation6 + $0x30] sm:$0xff]  ;;  %v623_v60 = vld [vmem:[#allocation6 + $0x20] sm:$0xff]  ;;  %v706_v16 = vld [vmem:[#allocation6 + $0x118] sm:$0xff] }
  0xee   :  { %v427_v54 = vpop.f32.mrf.mxu1  ;;  %685 = vmatpush.msra.mxu1 %v626_v49  ;;  %723 = vmatpush.msra.mxu2 %v714_v57  ;;  %v859_v49 = vld [vmem:[#allocation8 + $0x178] sm:$0xff]  ;;  %v768_v57 = vld [vmem:[#allocation8 + $0x40] sm:$0xff] }
  0xef   :  { %v436_v8 = vadd.f32 %v427_v54, %v377_v0  ;;  %v508_v28 = vmax.f32 %v503_v23, 0.0  ;;  %v650_v54 = vld [vmem:[#allocation6 + $0xe0] sm:$0xff]  ;;  %v647_v0 = vld [vmem:[#allocation6 + $0xc8] sm:$0xff] }
  0xf0   :  { %686 = vmatpush.msra.mxu1 %v625_v50  ;;  %657 = vmatpush.msra.mxu0 %v650_v54  ;;  %v786_v50 = vld [vmem:[#allocation8 + $0xb8] sm:$0xff]  ;;  %v857_v54 = vld [vmem:[#allocation8 + $0x168] sm:$0xff] }
  0xf1   :  { %724 = vmatpush.msra.mxu2 %v713_v59  ;;  %v783_v59 = vld [vmem:[#allocation8 + $0xa0] sm:$0xff] }
  0xf2   :  { %v486_v61 = vpop.f32.mrf.mxu2  ;;  %687 = vmatpush.msra.mxu1 %v624_v53  ;;  %658 = vmatpush.msra.mxu0 %v649_v56  ;;  %v769_v53 = vld [vmem:[#allocation8 + $0x48] sm:$0xff] }
  0xf3   :  { %v495_v11 = vadd.f32 %v486_v61, %v436_v8  ;;  %v622_v61 = vld [vmem:[#allocation6 + $0x18] sm:$0xff]  ;;  %v644_v8 = vld [vmem:[#allocation6 + $0xb0] sm:$0xff]  ;;  %v784_v56 = vld [vmem:[#allocation8 + $0xa8] sm:$0xff] }
  0xf4   :  { %v371_v1 = vpop.f32.mrf.mxu0  ;;  %688 = vmatpush.msra.mxu1 %v623_v60  ;;  %659 = vmatpush.msra.mxu0 %v648_v58  ;;  %v856_v58 = vld [vmem:[#allocation8 + $0x160] sm:$0xff]  ;;  %v767_v60 = vld [vmem:[#allocation8 + $0x38] sm:$0xff] }
  0xf5   :  { %v378_v4 = vadd.f32 %v371_v1, %v319_v63  ;;  %v504_v20 = vadd.f32 %v1020_v14, %v495_v11  ;;  %v712_v1 = vld [vmem:[#allocation6 + $0x148] sm:$0xff] }
  0xf6   :  { %v430_v5 = vpop.f32.mrf.mxu1  ;;  %689 = vmatpush.msra.mxu1 %v622_v61  ;;  %660 = vmatpush.msra.mxu0 %v647_v0  ;;  %v643_v11 = vld [vmem:[#allocation6 + $0xa8] sm:$0xff]  ;;  %v855_v61 = vld [vmem:[#allocation8 + $0x158] sm:$0xff]  ;;  %v854_v0 = vld [vmem:[#allocation8 + $0x150] sm:$0xff] }
  0xf7   :  { %v437_v12 = vadd.f32 %v430_v5, %v378_v4  ;;  %v509_v26 = vmax.f32 %v504_v20, 0.0  ;;  %725 = vmatpush.msra.mxu2 %v712_v1  ;;  %v711_v4 = vld [vmem:[#allocation6 + $0x140] sm:$0xff]  ;;  %v704_v20 = vld [vmem:[#allocation6 + $0x108] sm:$0xff]  ;;  %v781_v1 = vld [vmem:[#allocation8 + $0x90] sm:$0xff] }
  0xf8   :  { %690 = vmatpush.msra.mxu1 %v621_v62  ;;  %661 = vmatpush.msra.mxu0 %v646_v3  ;;  %v619_v5 = vld [vmem:[#allocation6] sm:$0xff]  ;;  %v782_v62 = vld [vmem:[#allocation8 + $0x98] sm:$0xff]  ;;  %v853_v3 = vld [vmem:[#allocation8 + $0x148] sm:$0xff] }
  0xf9   :  { %726 = vmatpush.msra.mxu2 %v711_v4  ;;  %v780_v4 = vld [vmem:[#allocation8 + $0x88] sm:$0xff] }
  0xfa   :  { %v489_v13 = vpop.f32.mrf.mxu2  ;;  %691 = vmatpush.msra.mxu1 %v620_v2  ;;  %662 = vmatpush.msra.mxu0 %v645_v6  ;;  %v765_v2 = vld [vmem:[#allocation8 + $0x28] sm:$0xff]  ;;  %v852_v6 = vld [vmem:[#allocation8 + $0x140] sm:$0xff] }
  0xfb   :  { %v496_v17 = vadd.f32 %v489_v13, %v437_v12  ;;  %727 = vmatpush.msra.mxu2 %v710_v7  ;;  %v708_v12 = vld [vmem:[#allocation6 + $0x128] sm:$0xff]  ;;  %v642_v13 = vld [vmem:[#allocation6 + $0xa0] sm:$0xff] }
  0xfc   :  { %692 = vmatpush.msra.mxu1 %v619_v5  ;;  %663 = vmatpush.msra.mxu0 %v644_v8  ;;  %v764_v5 = vld [vmem:[#allocation8 + $0x20] sm:$0xff]  ;;  %v763_v8 = vld [vmem:[#allocation8 + $0x18] sm:$0xff] }
  0xfd   :  { %v505_v21 = vadd.f32 %v1020_v14, %v496_v17  ;;  %728 = vmatpush.msra.mxu2 %v709_v9  ;;  %v707_v14 = vld [vmem:[#allocation6 + $0x120] sm:$0xff]  ;;  %v640_v17 = vld [vmem:[#allocation6 + $0x90] sm:$0xff]  ;;  %v851_v9 = vld [vmem:[#allocation8 + $0x138] sm:$0xff] }
  0xfe   :  { %664 = vmatpush.msra.mxu0 %v643_v11  ;;  %860 = vmatpush.msrb.mxu1 %v859_v49  ;;  %v779_v7 = vld [vmem:[#allocation8 + $0x80] sm:$0xff]  ;;  %v850_v11 = vld [vmem:[#allocation8 + $0x130] sm:$0xff] }
  0xff   :  { %v510_v24 = vmax.f32 %v505_v21, 0.0  ;;  %729 = vmatpush.msra.mxu2 %v708_v12  ;;  %v638_v21 = vld [vmem:[#allocation6 + $0x80] sm:$0xff]  ;;  %v761_v12 = vld [vmem:[#allocation8 + $0x8] sm:$0xff] }
 0x100   :  { %665 = vmatpush.msra.mxu0 %v642_v13  ;;  %861 = vmatpush.msrb.mxu1 %v858_v52  ;;  %v849_v13 = vld [vmem:[#allocation8 + $0x128] sm:$0xff]  ;;  %v952_v52 = vld [vmem:[%s1443_s12 + $0x60] sm:$0xff] }
 0x101   :  { %999 = vmatpush.msk.msrb.mxu3 %vm520_vm0, %v510_v24  ;;  %730 = vmatpush.msra.mxu2 %v707_v14  ;;  %v760_v14 = vld [vmem:[#allocation8] sm:$0xff] }
 0x102   :  { %666 = vmatpush.msra.mxu0 %v641_v15  ;;  %862 = vmatpush.msrb.mxu1 %v857_v54  ;;  %v848_v15 = vld [vmem:[#allocation8 + $0x120] sm:$0xff]  ;;  %v951_v54 = vld [vmem:[%s1443_s12 + $0x58] sm:$0xff] }
 0x103   :  { %536 = vmatpush.msrb.mxu3 %v509_v26  ;;  %731 = vmatpush.msra.mxu2 %v706_v16  ;;  %v847_v16 = vld [vmem:[#allocation8 + $0x118] sm:$0xff] }
 0x104   :  { %667 = vmatpush.msra.mxu0 %v640_v17  ;;  %863 = vmatpush.msrb.mxu1 %v856_v58  ;;  %v846_v17 = vld [vmem:[#allocation8 + $0x110] sm:$0xff] }
 0x105   :  { %537 = vmatpush.msrb.mxu3 %v508_v28  ;;  %732 = vmatpush.msra.mxu2 %v705_v18  ;;  %v845_v18 = vld [vmem:[#allocation8 + $0x108] sm:$0xff] }
 0x106   :  { %668 = vmatpush.msra.mxu0 %v639_v19  ;;  %864 = vmatpush.msrb.mxu1 %v855_v61  ;;  %v844_v19 = vld [vmem:[#allocation8 + $0x100] sm:$0xff]  ;;  %v949_v61 = vld [vmem:[%s1443_s12 + $0x48] sm:$0xff] }
 0x107   :  { %538 = vmatpush.msrb.mxu3 %v507_v29  ;;  %733 = vmatpush.msra.mxu2 %v704_v20 }
 0x108   :  { %669 = vmatpush.msra.mxu0 %v638_v21  ;;  %865 = vmatpush.msrb.mxu1 %v854_v0  ;;  %v948_v0 = vld [vmem:[%s1443_s12 + $0x40] sm:$0xff] }
 0x109   :  { %539 = vmatpush.msrb.mxu3 %v506_v30  ;;  %734 = vmatpush.msra.mxu2 %v703_v22 }
 0x10a   :  { %1000 = vmatmul.msk.f32.vlgmr.msrb.gmra.mxu3 %vm513_vm1, %v511_v31  ;;  %818 = vmatpush.msrb.mxu0 %v775_v37 }
 0x10b   :  { %1004 = vmatpush.msk.msra.mxu3 %vm520_vm0, %v510_v24  ;;  %866 = vmatpush.msrb.mxu1 %v853_v3 }
 0x10c   :  { %819 = vmatpush.msrb.mxu0 %v774_v39 }
 0x10d   :  { %568 = vmatpush.msra.mxu3 %v509_v26  ;;  %867 = vmatpush.msrb.mxu1 %v852_v6 }
 0x10e   :  { %820 = vmatpush.msrb.mxu0 %v773_v41 }
 0x10f   :  { %569 = vmatpush.msra.mxu3 %v508_v28  ;;  %868 = vmatpush.msrb.mxu1 %v851_v9  ;;  %v944_v9 = vld [vmem:[%s1443_s12 + $0x20] sm:$0xff] }
 0x110   :  { %821 = vmatpush.msrb.mxu0 %v772_v43 }
 0x111   :  { %570 = vmatpush.msra.mxu3 %v507_v29  ;;  %869 = vmatpush.msrb.mxu1 %v850_v11 }
 0x112   :  { %1001 = vmatmul.msk.f32.gmra.mxu3 %vm513_vm1, %v512_v32  ;;  %822 = vmatpush.msrb.mxu0 %v771_v48  ;;  %v953_v48 = vld [vmem:[%s1443_s12 + $0x68] sm:$0xff] }
 0x113   :  { %571 = vmatpush.msra.mxu3 %v506_v30  ;;  %870 = vmatpush.msrb.mxu1 %v849_v13 }
 0x114   :  { %823 = vmatpush.msrb.mxu0 %v770_v51 }
 0x115   :  { %1009 = vmatpush.msk.msrb.mxu3 %vm520_vm0, %v510_v24  ;;  %871 = vmatpush.msrb.mxu1 %v848_v15  ;;  %v941_v15 = vld [vmem:[%s1443_s12 + $0x8] sm:$0xff] }
 0x116   :  { %824 = vmatpush.msrb.mxu0 %v769_v53 }
 0x117   :  { %600 = vmatpush.msrb.mxu3 %v509_v26  ;;  %872 = vmatpush.msrb.mxu1 %v847_v16  ;;  %v940_v16 = vld [vmem:[%s1443_s12] sm:$0xff] }
 0x118   :  { %825 = vmatpush.msrb.mxu0 %v768_v57 }
 0x119   :  { %601 = vmatpush.msrb.mxu3 %v508_v28  ;;  %873 = vmatpush.msrb.mxu1 %v846_v17  ;;  %v1023_v17 = vld [vmem:[%s1441_s10] ss:$0 sm:$0xff] }
 0x11a   :  { %1005 = vmatmul.msk.f32.vlgmr.msra.gmra.mxu3 %vm513_vm1, %v1002_v33  ;;  %826 = vmatpush.msrb.mxu0 %v767_v60 }
 0x11b   :  { %602 = vmatpush.msrb.mxu3 %v507_v29  ;;  %874 = vmatpush.msrb.mxu1 %v845_v18  ;;  %v1024_v18 = vld [vmem:[%s1442_s11] ss:$0 sm:$0xff] }
 0x11d   :  { %603 = vmatpush.msrb.mxu3 %v506_v30  ;;  %875 = vmatpush.msrb.mxu1 %v844_v19 }
 0x122   :  { %1006 = vmatmul.msk.f32.gmra.mxu3 %vm513_vm1, %v1003_v34 }
 0x12a   :  { %1010 = vmatmul.msk.f32.vlgmr.msrb.gmra.mxu3 %vm513_vm1, %v1007_v35 }
 0x132   :  { %1011 = vmatmul.msk.f32.gmra.mxu3 %vm513_vm1, %v1008_v36  ;;  %v794_v36 = vld [vmem:[#allocation8 + $0xf8] sm:$0xff] }
 0x133   :  { %795 = vmatpush.msra.mxu3 %v794_v36  ;;  %v753_v36 = vld [vmem:[%s1439_s8 + $0x8] sm:$0x3] }
 0x135   :  { %796 = vmatpush.msra.mxu3 %v793_v38 }
 0x137   :  { %797 = vmatpush.msra.mxu3 %v792_v40 }
 0x139   :  { %798 = vmatpush.msra.mxu3 %v791_v42 }
 0x13b   :  { %799 = vmatpush.msra.mxu3 %v790_v44 }
 0x13d   :  { %800 = vmatpush.msra.mxu3 %v789_v45  ;;  %v955_v45 = vld [vmem:[%s1443_s12 + $0x78] sm:$0xff] }
 0x13e   :  { %960 = vmatpush.msrb.mxu2 %v955_v45 }
 0x13f   :  { %801 = vmatpush.msra.mxu3 %v788_v46  ;;  %v954_v46 = vld [vmem:[%s1443_s12 + $0x70] sm:$0xff] }
 0x140   :  { %961 = vmatpush.msrb.mxu2 %v954_v46 }
 0x141   :  { %802 = vmatpush.msra.mxu3 %v787_v47 }
 0x142   :  { %962 = vmatpush.msrb.mxu2 %v953_v48 }
 0x143   :  { %803 = vmatpush.msra.mxu3 %v786_v50  ;;  %v1022_v50 = vld [vmem:[%s1438_s7] ss:$0 sm:$0xff] }
 0x144   :  { %963 = vmatpush.msrb.mxu2 %v952_v52 }
 0x145   :  { %804 = vmatpush.msra.mxu3 %v785_v55 }
 0x146   :  { %964 = vmatpush.msrb.mxu2 %v951_v54 }
 0x147   :  { %805 = vmatpush.msra.mxu3 %v784_v56  ;;  %v950_v56 = vld [vmem:[%s1443_s12 + $0x50] sm:$0xff] }
 0x148   :  { %965 = vmatpush.msrb.mxu2 %v950_v56 }
 0x149   :  { %806 = vmatpush.msra.mxu3 %v783_v59 }
 0x14a   :  { %966 = vmatpush.msrb.mxu2 %v949_v61 }
 0x14b   :  { %807 = vmatpush.msra.mxu3 %v782_v62 }
 0x14c   :  { %967 = vmatpush.msrb.mxu2 %v948_v0 }
 0x14d   :  { %808 = vmatpush.msra.mxu3 %v781_v1 }
 0x14f   :  { %809 = vmatpush.msra.mxu3 %v780_v4  ;;  %v894_v4 = vld [vmem:[%s1439_s8 + $0x8] sm:$0x3] }
 0x151   :  { %810 = vmatpush.msra.mxu3 %v779_v7  ;;  %v945_v7 = vld [vmem:[%s1443_s12 + $0x28] sm:$0xff] }
 0x18d   :  { %v541_v63 = vpop.f32.mrf.mxu3 }
 0x195   :  { %v544_v10 = vpop.f32.mrf.mxu3 }
 0x19d   :  { %v573_v23 = vpop.f32.mrf.mxu3 }
 0x19e   :  { %v611_v25 = vmax.f32 %v541_v63, %v573_v23  ;;  %v766_v63 = vld [vmem:[#allocation8 + $0x30] sm:$0xff] }
 0x19f   :  { %827 = vmatpush.msrb.mxu0 %v766_v63  ;;  %v1021_v23 = vld [vmem:[%s1436_s5] ss:$0 sm:$0xff] }
 0x1a1   :  { %828 = vmatpush.msrb.mxu0 %v765_v2  ;;  %v947_v2 = vld [vmem:[%s1443_s12 + $0x38] sm:$0xff] }
 0x1a2   :  { %968 = vmatpush.msrb.mxu2 %v947_v2 }
 0x1a3   :  { %829 = vmatpush.msrb.mxu0 %v764_v5  ;;  %v946_v5 = vld [vmem:[%s1443_s12 + $0x30] sm:$0xff] }
 0x1a4   :  { %969 = vmatpush.msrb.mxu2 %v946_v5 }
 0x1a5   :  { %v576_v24 = vpop.f32.mrf.mxu3  ;;  %830 = vmatpush.msrb.mxu0 %v763_v8 }
 0x1a6   :  { %v612_v28 = vmax.f32 %v544_v10, %v576_v24  ;;  %v762_v10 = vld [vmem:[#allocation8 + $0x10] sm:$0xff]  ;;  %970 = vmatpush.msrb.mxu2 %v945_v7 }
 0x1a7   :  { %831 = vmatpush.msrb.mxu0 %v762_v10  ;;  %v943_v10 = vld [vmem:[%s1443_s12 + $0x18] sm:$0xff] }
 0x1a8   :  { %971 = vmatpush.msrb.mxu2 %v944_v9 }
 0x1a9   :  { %832 = vmatpush.msrb.mxu0 %v761_v12  ;;  %v899_v12 = vld [vmem:[%s1440_s9] sm:$0x3] }
 0x1aa   :  { %972 = vmatpush.msrb.mxu2 %v943_v10 }
 0x1ab   :  { %833 = vmatpush.msrb.mxu0 %v760_v14  ;;  %v942_v14 = vld [vmem:[%s1443_s12 + $0x10] sm:$0xff] }
 0x1ac   :  { %973 = vmatpush.msrb.mxu2 %v942_v14 }
 0x1ad   :  { %v605_v26 = vpop.f32.mrf.mxu3 }
 0x1ae   :  { %v613_v27 = vmax.f32 %v611_v25, %v605_v26  ;;  %974 = vmatpush.msrb.mxu2 %v941_v15 }
 0x1b0   :  { %615 = vst [vmem:[#allocation2] sm:$0xff] %v613_v27  ;;  %693 = vmatmul.f32.vlgmr.msra.gmra.mxu1 %v613_v27  ;;  %v752_v27 = vld [vmem:[%s1439_s8] sm:$0xff]  ;;  %975 = vmatpush.msrb.mxu2 %v940_v16 }
 0x1b5   :  { %v608_v29 = vpop.f32.mrf.mxu3 }
 0x1b6   :  { %v614_v30 = vmax.f32 %v612_v28, %v608_v29 }
 0x1b8   :  { %616 = vst [vmem:[#allocation2 + $0x8] sm:$0xf] %v614_v30 }
 0x1bf   :  { %v635_v31 = vld [vmem:[#allocation2 + $0x1] sm:$0xff]  ;;  %v636_v34 = vld [vmem:[#allocation2 + $0x9] sm:$0x3] }
 0x1c0   :  { %v618_v32 = vld [vmem:[#allocation2 + $0x8] sm:$0x3]  ;;  %670 = vmatmul.f32.vlgmr.msra.gmra.mxu0 %v635_v31  ;;  %v701_v35 = vld [vmem:[#allocation2 + $0xa] sm:$0x3] }
 0x1c1   :  { %v700_v33 = vld [vmem:[#allocation2 + $0x2] sm:$0xff]  ;;  %696 = vmatmul.f32.gmra.mxu1 %v618_v32 }
 0x1c2   :  { %735 = vmatmul.f32.vlgmr.msra.gmra.mxu2 %v700_v33 }
 0x1c8   :  { %673 = vmatmul.f32.gmra.mxu0 %v636_v34 }
 0x1ca   :  { %738 = vmatmul.f32.gmra.mxu2 %v701_v35 }
 0x22d   :  { %v694_v21 = vpop.f32.mrf.mxu1 }
 0x23d   :  { %v671_v20 = vpop.f32.mrf.mxu0 }
 0x23e   :  { %v695_v22 = vadd.f32 %v694_v21, %v671_v20  ;;  %v697_v30 = vpop.f32.mrf.mxu1 }
 0x245   :  { %v736_v24 = vpop.f32.mrf.mxu2  ;;  %v674_v28 = vpop.f32.mrf.mxu0 }
 0x246   :  { %v742_v25 = vadd.f32 %v736_v24, %v695_v22  ;;  %v698_v32 = vadd.f32 %v697_v30, %v674_v28  ;;  %v1025_v22 = vld [vmem:[%s1444_s13] ss:$0 sm:$0xff] }
 0x248   :  { %v748_v26 = vadd.f32 %v1021_v23, %v742_v25 }
 0x24a   :  { %v750_v29 = vmax.f32 %v748_v26, 0.0 }
 0x24c   :  { %v754_v31 = vmul.f32 %v752_v27, %v750_v29 }
 0x24d   :  { %v739_v33 = vpop.f32.mrf.mxu2 }
 0x24e   :  { %756 = vst [vmem:[#allocation2 + $0x1] sm:$0xff] %v754_v31  ;;  %v743_v34 = vadd.f32 %v739_v33, %v698_v32  ;;  %811 = vmatmul.f32.vlgmr.msra.gmra.mxu3 %v754_v31 }
 0x250   :  { %v749_v35 = vadd.f32 %v1021_v23, %v743_v34 }
 0x252   :  { %v751_v37 = vmax.f32 %v749_v35, 0.0 }
 0x254   :  { %v755_v38 = vmul.f32 %v753_v36, %v751_v37 }
 0x255   :  { %v758_v39 = vld [vmem:[#allocation2] sm:$0xff] }
 0x256   :  { %757 = vst [vmem:[#allocation2 + $0x9] sm:$0x3] %v755_v38  ;;  %834 = vmatmul.f32.vlgmr.msrb.gmra.mxu0 %v758_v39 }
 0x25d   :  { %v777_v40 = vld [vmem:[#allocation2 + $0x9] sm:$0x3] }
 0x25e   :  { %v759_v41 = vld [vmem:[#allocation2 + $0x8] sm:$0x3]  ;;  %814 = vmatmul.f32.gmra.mxu3 %v777_v40  ;;  %v842_v43 = vld [vmem:[#allocation2 + $0xa] sm:$0x3] }
 0x25f   :  { %v841_v42 = vld [vmem:[#allocation2 + $0x2] sm:$0xff]  ;;  %837 = vmatmul.f32.gmra.mxu0 %v759_v41 }
 0x260   :  { %876 = vmatmul.f32.vlgmr.msrb.gmra.mxu1 %v841_v42 }
 0x268   :  { %879 = vmatmul.f32.gmra.mxu1 %v842_v43 }
 0x2d1   :  { %v812_v47 = vpop.f32.mrf.mxu3 }
 0x2d3   :  { %v835_v44 = vpop.f32.mrf.mxu0 }
 0x2d4   :  { %v836_v49 = vadd.f32 %v835_v44, %v812_v47 }
 0x2dc   :  { %v838_v57 = vpop.f32.mrf.mxu0 }
 0x2dd   :  { %v877_v51 = vpop.f32.mrf.mxu1 }
 0x2de   :  { %v883_v53 = vadd.f32 %v877_v51, %v836_v49 }
 0x2e0   :  { %v889_v55 = vadd.f32 %v1022_v50, %v883_v53 }
 0x2e1   :  { %v815_v59 = vpop.f32.mrf.mxu3 }
 0x2e2   :  { %v891_v58 = vmax.f32 %v889_v55, 0.0  ;;  %v839_v60 = vadd.f32 %v838_v57, %v815_v59 }
 0x2e4   :  { %v895_v62 = vmul.f32 %v891_v58, %v752_v27 }
 0x2e5   :  { %v880_v63 = vpop.f32.mrf.mxu1 }
 0x2e6   :  { %897 = vst [vmem:[#allocation2 + $0x1] sm:$0xff] %v895_v62  ;;  %v884_v1 = vadd.f32 %v880_v63, %v839_v60 }
 0x2e8   :  { %v890_v3 = vadd.f32 %v1022_v50, %v884_v1 }
 0x2ea   :  { %v892_v6 = vmax.f32 %v890_v3, 0.0 }
 0x2ec   :  { %v896_v8 = vmul.f32 %v894_v4, %v892_v6 }
 0x2ed   :  { %v900_v13 = vld [vmem:[#allocation2] sm:$0xff] }
 0x2ee   :  { %898 = vst [vmem:[#allocation2 + $0x9] sm:$0x3] %v896_v8 }
 0x2f5   :  { %v901_v11 = vld [vmem:[#allocation2 + $0x8] sm:$0xf] }
 0x2f6   :  { %1012 = vmatpush.msk.msrb.mxu3 %vm906_vm2, %v901_v11 }
 0x2f8   :  { %925 = vmatpush.msrb.mxu3 %v900_v13 }
 0x2f9   :  { %1013 = vmatmul.msk.f32.vlgmr.msrb.gmra.mxu3 %vm902_vm3, %v899_v12 }
 0x37c   :  { %v927_v19 = vpop.f32.mrf.mxu3 }
 0x37d   :  { %v934_v20 = vmul.f32 %v1023_v17, %v927_v19 }
 0x37f   :  { %v939_v21 = vadd.f32 %v1024_v18, %v934_v20 }
 0x381   :  { %976 = vmatmul.f32.vlgmr.msrb.gmra.mxu2 %v939_v21 }
 0x404   :  { %v977_v23 = vpop.f32.mrf.mxu2 }
 0x405   :  { %v978_v24 = vadd.f32 %v1025_v22, %v977_v23 }
 0x407   :  { %980 = vst [vmem:[#allocation9] sm:$0x3] %v978_v24 }
 0x408   :  { %991 = dma.vmem_to_hbm [thread:$0]  %s987_s17, 32, %s989_s19, [#allocation5]  }
 0x409   :  { %1126 = dma.done.wait [#allocation5], 32  }
 0x40a   :  { %1127 = vsyncadd [#allocation5], 4294967264 }
 0x40b   :  { %996 = vsyncpa [#allocation4], 1 }
 0x40c   :  { %997 = vsyncpa [#allocation7], 1 }
 0x40d   :  { %998 = vsyncpa [#allocation5], 1 }

</bundles_post_ra>
